<compile_context>
chip_gen: v7x
topology: tpu7x:2x2x1
jax: 0.10.0
libtpu: 0.0.40
codegen_flags: <defaults>
</compile_context>

<pallas_src>
import functools

import jax
import jax.numpy as jnp
from jax.experimental import pallas as pl
from jax.experimental.pallas import tpu as pltpu

KSIZE = 7
PAD = 3


def _fused_kernel(x_ref, w_ref, b_ref, o_ref, acc_ref, pad_ref, *,
                  C, ct, H, W, needs_mask):
    """Running channel sum/max over the C-tile axis + fused 7x7 conv epilogue."""
    HW = H * W
    Wp = W + 2 * PAD
    c = pl.program_id(1)

    # ---------------- channel-reduction phase (every grid step) ----------------
    x = x_ref[0].astype(jnp.float32)                    # (ct, HW), cast per tile
    if needs_mask:
        valid = jnp.minimum(C - c * ct, ct)             # channels valid in this tile
        ch = jax.lax.broadcasted_iota(jnp.int32, (ct, HW), 0)
        m = ch < valid
        xs = jnp.where(m, x, 0.0)                       # sum branch: 0 fill
        xm = jnp.where(m, x, -jnp.inf)                  # max branch: -inf fill
    else:
        xs = x
        xm = x
    psum = jnp.sum(xs, axis=0, keepdims=True)           # (1, HW)
    pmax = jnp.max(xm, axis=0, keepdims=True)           # (1, HW)

    @pl.when(c == 0)
    def _():
        # Zero the padded conv planes once per batch element (halo must be 0;
        # the interior is overwritten in the epilogue).  Tiny (2*Hp*Wp floats).
        pad_ref[...] = jnp.zeros_like(pad_ref)
        acc_ref[0:1, :] = psum
        acc_ref[1:2, :] = pmax

    @pl.when(c > 0)
    def _():
        acc_ref[0:1, :] = acc_ref[0:1, :] + psum
        acc_ref[1:2, :] = jnp.maximum(acc_ref[1:2, :], pmax)

    # ------------- epilogue: 7x7 conv (weights pre-scaled) + sigmoid -----------
    @pl.when(c == pl.num_programs(1) - 1)
    def _():
        # Scatter the flat (2, HW) accumulators into the zero-padded planes
        # (row-by-row relayout; happens once per batch element).
        for p in range(2):
            for i in range(H):
                row = acc_ref[pl.ds(p, 1), pl.ds(i * W, W)]          # (1, W)
                pad_ref[p, pl.ds(PAD + i, 1), pl.ds(PAD, W)] = row

        # Column-grouped accumulation:
        #   q[kj] = sum_p sum_ki w[p,ki,kj] * padded_p[ki:ki+H, :]
        # -> 14 misaligned sublane reads total, 98 aligned MACs,
        #    then only 7 lane-shift slices for the final combine.
        q = [jnp.zeros((H, Wp), jnp.float32) for _ in range(KSIZE)]
        for p in range(2):
            for ki in range(KSIZE):
                t = pad_ref[p, pl.ds(ki, H), :]                      # (H, Wp)
                base = p * (KSIZE * KSIZE) + ki * KSIZE
                for kj in range(KSIZE):
                    q[kj] = q[kj] + w_ref[base + kj] * t
        conv = q[0][:, 0:W]
        for kj in range(1, KSIZE):
            conv = conv + q[kj][:, kj:kj + W]
        o_ref[0, 0] = jax.nn.sigmoid(conv + b_ref[0])


def _per_block_budget_bytes():
    """Per-block input budget: ~4 MiB on 64-MiB-VMEM parts (v7x), ~8 MiB otherwise."""
    try:
        info = pltpu.get_tpu_info()
        cap = getattr(info, "vmem_capacity_bytes", None)
        if cap is not None and cap > 64 * 1024 * 1024:
            return 8 * 1024 * 1024      # v5e / v6e: 128 MiB physical VMEM
        return 4 * 1024 * 1024          # v7x (64 MiB) or unknown
    except Exception:
        return 4 * 1024 * 1024


def _pick_c_tile(C, HW, itemsize, budget_bytes):
    """Channel-tile size; accounts for lane padding of the VMEM block."""
    hw_pad = pl.cdiv(HW, 128) * 128
    per_c = hw_pad * itemsize
    if C * per_c <= budget_bytes:
        return C                                         # single tile, no mask
    # sublane packing granularity by dtype: f32->8, bf16->16, int8->32
    g = {4: 8, 2: 16, 1: 32}.get(itemsize, 8)
    ct = (budget_bytes // per_c) // g * g
    return max(g, ct)


def spatial_attention(x, weight, bias):
    """x: (N, C, H, W) native dtype; weight: (1, 2, 7, 7); bias: (1,) -> (N,1,H,W) f32."""
    N, C, H, W = x.shape
    HW = H * W
    Hp, Wp = H + 2 * PAD, W + 2 * PAD

    # Fold 1/C of the channel mean into the avg-branch weights; flatten for SMEM.
    w = weight.astype(jnp.float32)[0]                     # (2, 7, 7)
    w = jnp.concatenate([w[0:1] / C, w[1:2]], axis=0)     # scale avg branch by 1/C
    w_flat = w.reshape(-1)                                # (98,)
    b = bias.astype(jnp.float32).reshape(1)               # (1,)

    itemsize = jnp.dtype(x.dtype).itemsize
    ct = _pick_c_tile(C, HW, itemsize, _per_block_budget_bytes())
    kc = pl.cdiv(C, ct)
    needs_mask = (C % ct) != 0

    x_flat = x.reshape(N, C, HW)                          # free contiguous view, native dtype

    kernel = functools.partial(_fused_kernel, C=C, ct=ct, H=H, W=W,
                               needs_mask=needs_mask)

    out = pl.pallas_call(
        kernel,
        out_shape=jax.ShapeDtypeStruct((N, 1, H, W), jnp.float32),
        grid_spec=pltpu.PrefetchScalarGridSpec(
            num_scalar_prefetch=0,
            grid=(N, kc),
            in_specs=[
                pl.BlockSpec((1, ct, HW), lambda n, c: (n, c, 0)),
                pl.BlockSpec(memory_space=pltpu.MemorySpace.SMEM),   # w_flat (98,)
                pl.BlockSpec(memory_space=pltpu.MemorySpace.SMEM),   # bias   (1,)
            ],
            out_specs=pl.BlockSpec((1, 1, H, W), lambda n, c: (n, 0, 0, 0)),
            scratch_shapes=[
                pltpu.VMEM((2, HW), jnp.float32),        # running channel sum / max
                pltpu.VMEM((2, Hp, Wp), jnp.float32),    # zero-padded conv planes
            ],
        ),
        compiler_params=pltpu.CompilerParams(
            dimension_semantics=("parallel", "arbitrary"),
            vmem_limit_bytes=32 * 1024 * 1024,
        ),
    )(x_flat, w_flat, b)

    return out


def _reference(x, weight, bias):
    xf = x.astype(jnp.float32)
    avg = jnp.mean(xf, axis=1, keepdims=True)
    mx = jnp.max(xf, axis=1, keepdims=True)
    cat = jnp.concatenate([avg, mx], axis=1)
    conv = jax.lax.conv_general_dilated(
        cat, weight.astype(jnp.float32), window_strides=(1, 1),
        padding=((PAD, PAD), (PAD, PAD)),
        dimension_numbers=("NCHW", "OIHW", "NCHW"))
    return jax.nn.sigmoid(conv + bias.astype(jnp.float32)[None, :, None, None])


if __name__ == "__main__":
    key = jax.random.PRNGKey(0)
    kx, kw, kb = jax.random.split(key, 3)

    N, C, H, W = 2, 4, 16, 16
    x = jax.random.normal(kx, (N, C, H, W), dtype=jnp.float32)
    # Deterministic synthetic conv parameters (shapes from nn.Conv2d(2, 1, 7, padding=3)).
    weight = jax.random.normal(kw, (1, 2, KSIZE, KSIZE), dtype=jnp.float32) * 0.1
    bias = jax.random.normal(kb, (1,), dtype=jnp.float32) * 0.1

    out = spatial_attention(x, weight, bias)
    out = jax.block_until_ready(out)

    ref = _reference(x, weight, bias)
    assert out.shape == (N, 1, H, W)
    assert jnp.max(jnp.abs(out - ref)) < 1e-5

    print("KERNEL_OK")
</pallas_src>

<mosaic_0001>
module attributes {stable_mosaic.version = 11 : i64} {
  func.func @_fused_kernel(%arg0: i32, %arg1: i32, %arg2: memref<1x4x256xf32, #tpu.memory_space<vmem>>, %arg3: memref<98xf32, #tpu.memory_space<smem>>, %arg4: memref<1xf32, #tpu.memory_space<smem>>, %arg5: memref<1x1x16x16xf32, #tpu.memory_space<vmem>>, %arg6: memref<2x256xf32, #tpu.memory_space<vmem>>, %arg7: memref<2x22x22xf32, #tpu.memory_space<vmem>>) attributes {dimension_semantics = [#tpu.dimension_semantics<parallel>, #tpu.dimension_semantics<arbitrary>], iteration_bounds = array<i64: 2, 1>, scalar_prefetch = 0 : i64, scratch_operands = 2 : i64, tpu.core_type = #tpu.core_type<tc>, window_params = [{transform_indices = @transform_0, window_bounds = array<i64: 1, 4, 256>}, {transform_indices = @transform_1, window_bounds = array<i64: 98>}, {transform_indices = @transform_2, window_bounds = array<i64: 1>}, {transform_indices = @transform_3, window_bounds = array<i64: 1, 1, 16, 16>}]} {
    %c0 = arith.constant 0 : index
    %c0_0 = arith.constant 0 : index
    %c0_1 = arith.constant 0 : index
    %0 = vector.load %arg2[%c0, %c0_0, %c0_1] : memref<1x4x256xf32, #tpu.memory_space<vmem>>, vector<1x4x256xf32>
    %1 = vector.shape_cast %0 : vector<1x4x256xf32> to vector<4x256xf32>
    %cst = arith.constant dense<0.000000e+00> : vector<256xf32>
    %2 = vector.multi_reduction <add>, %1, %cst [0] : vector<4x256xf32> to vector<256xf32>
    %3 = vector.shape_cast %2 : vector<256xf32> to vector<1x256xf32>
    %cst_2 = arith.constant dense<0xFF800000> : vector<256xf32>
    %4 = vector.multi_reduction <maximumf>, %1, %cst_2 [0] : vector<4x256xf32> to vector<256xf32>
    %5 = vector.shape_cast %4 : vector<256xf32> to vector<1x256xf32>
    %c0_i32 = arith.constant 0 : i32
    %6 = arith.cmpi eq, %arg1, %c0_i32 : i32
    %7 = arith.extui %6 : i1 to i32
    %c0_i32_3 = arith.constant 0 : i32
    %8 = arith.cmpi ne, %7, %c0_i32_3 : i32
    scf.if %8 {
      %cst_8 = arith.constant 0.000000e+00 : f32
      %15 = vector.broadcast %cst_8 : f32 to vector<2x22x22xf32>
      %c0_9 = arith.constant 0 : index
      %c0_10 = arith.constant 0 : index
      %c0_11 = arith.constant 0 : index
      %16 = vector.load %arg7[%c0_9, %c0_10, %c0_11] : memref<2x22x22xf32, #tpu.memory_space<vmem>>, vector<2x22x22xf32>
      tpu.vector_store %arg7[%c0_9, %c0_10, %c0_11], %15 {strides = array<i32>} : memref<2x22x22xf32, #tpu.memory_space<vmem>>, vector<2x22x22xf32>,
      %c0_12 = arith.constant 0 : index
      %c0_13 = arith.constant 0 : index
      %17 = vector.load %arg6[%c0_12, %c0_13] : memref<2x256xf32, #tpu.memory_space<vmem>>, vector<1x256xf32>
      tpu.vector_store %arg6[%c0_12, %c0_13], %3 {strides = array<i32>} : memref<2x256xf32, #tpu.memory_space<vmem>>, vector<1x256xf32>,
      %c1 = arith.constant 1 : index
      %c0_14 = arith.constant 0 : index
      %18 = vector.load %arg6[%c1, %c0_14] : memref<2x256xf32, #tpu.memory_space<vmem>>, vector<1x256xf32>
      tpu.vector_store %arg6[%c1, %c0_14], %5 {strides = array<i32>} : memref<2x256xf32, #tpu.memory_space<vmem>>, vector<1x256xf32>,
    } else {
    }
    %c0_i32_4 = arith.constant 0 : i32
    %9 = arith.cmpi sgt, %arg1, %c0_i32_4 : i32
    %10 = arith.extui %9 : i1 to i32
    %c0_i32_5 = arith.constant 0 : i32
    %11 = arith.cmpi ne, %10, %c0_i32_5 : i32
    scf.if %11 {
      %c0_8 = arith.constant 0 : index
      %c0_9 = arith.constant 0 : index
      %15 = vector.load %arg6[%c0_8, %c0_9] : memref<2x256xf32, #tpu.memory_space<vmem>>, vector<1x256xf32>
      %16 = arith.addf %15, %3 : vector<1x256xf32>
      %c0_10 = arith.constant 0 : index
      %c0_11 = arith.constant 0 : index
      %17 = vector.load %arg6[%c0_10, %c0_11] : memref<2x256xf32, #tpu.memory_space<vmem>>, vector<1x256xf32>
      tpu.vector_store %arg6[%c0_10, %c0_11], %16 {strides = array<i32>} : memref<2x256xf32, #tpu.memory_space<vmem>>, vector<1x256xf32>,
      %c1 = arith.constant 1 : index
      %c0_12 = arith.constant 0 : index
      %18 = vector.load %arg6[%c1, %c0_12] : memref<2x256xf32, #tpu.memory_space<vmem>>, vector<1x256xf32>
      %19 = arith.maximumf %18, %5 : vector<1x256xf32>
      %c1_13 = arith.constant 1 : index
      %c0_14 = arith.constant 0 : index
      %20 = vector.load %arg6[%c1_13, %c0_14] : memref<2x256xf32, #tpu.memory_space<vmem>>, vector<1x256xf32>
      tpu.vector_store %arg6[%c1_13, %c0_14], %19 {strides = array<i32>} : memref<2x256xf32, #tpu.memory_space<vmem>>, vector<1x256xf32>,
    } else {
    }
    %c0_i32_6 = arith.constant 0 : i32
    %12 = arith.cmpi eq, %arg1, %c0_i32_6 : i32
    %13 = arith.extui %12 : i1 to i32
    %c0_i32_7 = arith.constant 0 : i32
    %14 = arith.cmpi ne, %13, %c0_i32_7 : i32
    scf.if %14 {
      %c0_8 = arith.constant 0 : index
      %c0_9 = arith.constant 0 : index
      %15 = vector.load %arg6[%c0_8, %c0_9] : memref<2x256xf32, #tpu.memory_space<vmem>>, vector<1x16xf32>
      %c0_10 = arith.constant 0 : index
      %c3 = arith.constant 3 : index
      %c3_11 = arith.constant 3 : index
      %16 = vector.load %arg7[%c0_10, %c3, %c3_11] : memref<2x22x22xf32, #tpu.memory_space<vmem>>, vector<1x1x16xf32>
      %17 = vector.shape_cast %16 : vector<1x1x16xf32> to vector<1x16xf32>
      %18 = vector.shape_cast %15 : vector<1x16xf32> to vector<1x1x16xf32>
      tpu.vector_store %arg7[%c0_10, %c3, %c3_11], %18 {strides = array<i32>} : memref<2x22x22xf32, #tpu.memory_space<vmem>>, vector<1x1x16xf32>,
      %c0_12 = arith.constant 0 : index
      %c16 = arith.constant 16 : index
      %19 = vector.load %arg6[%c0_12, %c16] : memref<2x256xf32, #tpu.memory_space<vmem>>, vector<1x16xf32>
      %c0_13 = arith.constant 0 : index
      %c4 = arith.constant 4 : index
      %c3_14 = arith.constant 3 : index
      %20 = vector.load %arg7[%c0_13, %c4, %c3_14] : memref<2x22x22xf32, #tpu.memory_space<vmem>>, vector<1x1x16xf32>
      %21 = vector.shape_cast %20 : vector<1x1x16xf32> to vector<1x16xf32>
      %22 = vector.shape_cast %19 : vector<1x16xf32> to vector<1x1x16xf32>
      tpu.vector_store %arg7[%c0_13, %c4, %c3_14], %22 {strides = array<i32>} : memref<2x22x22xf32, #tpu.memory_space<vmem>>, vector<1x1x16xf32>,
      %c0_15 = arith.constant 0 : index
      %c32 = arith.constant 32 : index
      %23 = vector.load %arg6[%c0_15, %c32] : memref<2x256xf32, #tpu.memory_space<vmem>>, vector<1x16xf32>
      %c0_16 = arith.constant 0 : index
      %c5 = arith.constant 5 : index
      %c3_17 = arith.constant 3 : index
      %24 = vector.load %arg7[%c0_16, %c5, %c3_17] : memref<2x22x22xf32, #tpu.memory_space<vmem>>, vector<1x1x16xf32>
      %25 = vector.shape_cast %24 : vector<1x1x16xf32> to vector<1x16xf32>
      %26 = vector.shape_cast %23 : vector<1x16xf32> to vector<1x1x16xf32>
      tpu.vector_store %arg7[%c0_16, %c5, %c3_17], %26 {strides = array<i32>} : memref<2x22x22xf32, #tpu.memory_space<vmem>>, vector<1x1x16xf32>,
      %c0_18 = arith.constant 0 : index
      %c48 = arith.constant 48 : index
      %27 = vector.load %arg6[%c0_18, %c48] : memref<2x256xf32, #tpu.memory_space<vmem>>, vector<1x16xf32>
      %c0_19 = arith.constant 0 : index
      %c6 = arith.constant 6 : index
      %c3_20 = arith.constant 3 : index
      %28 = vector.load %arg7[%c0_19, %c6, %c3_20] : memref<2x22x22xf32, #tpu.memory_space<vmem>>, vector<1x1x16xf32>
      %29 = vector.shape_cast %28 : vector<1x1x16xf32> to vector<1x16xf32>
      %30 = vector.shape_cast %27 : vector<1x16xf32> to vector<1x1x16xf32>
      tpu.vector_store %arg7[%c0_19, %c6, %c3_20], %30 {strides = array<i32>} : memref<2x22x22xf32, #tpu.memory_space<vmem>>, vector<1x1x16xf32>,
      %c0_21 = arith.constant 0 : index
      %c64 = arith.constant 64 : index
      %31 = vector.load %arg6[%c0_21, %c64] : memref<2x256xf32, #tpu.memory_space<vmem>>, vector<1x16xf32>
      %c0_22 = arith.constant 0 : index
      %c7 = arith.constant 7 : index
      %c3_23 = arith.constant 3 : index
      %32 = vector.load %arg7[%c0_22, %c7, %c3_23] : memref<2x22x22xf32, #tpu.memory_space<vmem>>, vector<1x1x16xf32>
      %33 = vector.shape_cast %32 : vector<1x1x16xf32> to vector<1x16xf32>
      %34 = vector.shape_cast %31 : vector<1x16xf32> to vector<1x1x16xf32>
      tpu.vector_store %arg7[%c0_22, %c7, %c3_23], %34 {strides = array<i32>} : memref<2x22x22xf32, #tpu.memory_space<vmem>>, vector<1x1x16xf32>,
      %c0_24 = arith.constant 0 : index
      %c80 = arith.constant 80 : index
      %35 = vector.load %arg6[%c0_24, %c80] : memref<2x256xf32, #tpu.memory_space<vmem>>, vector<1x16xf32>
      %c0_25 = arith.constant 0 : index
      %c8 = arith.constant 8 : index
      %c3_26 = arith.constant 3 : index
      %36 = vector.load %arg7[%c0_25, %c8, %c3_26] : memref<2x22x22xf32, #tpu.memory_space<vmem>>, vector<1x1x16xf32>
      %37 = vector.shape_cast %36 : vector<1x1x16xf32> to vector<1x16xf32>
      %38 = vector.shape_cast %35 : vector<1x16xf32> to vector<1x1x16xf32>
      tpu.vector_store %arg7[%c0_25, %c8, %c3_26], %38 {strides = array<i32>} : memref<2x22x22xf32, #tpu.memory_space<vmem>>, vector<1x1x16xf32>,
      %c0_27 = arith.constant 0 : index
      %c96 = arith.constant 96 : index
      %39 = vector.load %arg6[%c0_27, %c96] : memref<2x256xf32, #tpu.memory_space<vmem>>, vector<1x16xf32>
      %c0_28 = arith.constant 0 : index
      %c9 = arith.constant 9 : index
      %c3_29 = arith.constant 3 : index
      %40 = vector.load %arg7[%c0_28, %c9, %c3_29] : memref<2x22x22xf32, #tpu.memory_space<vmem>>, vector<1x1x16xf32>
      %41 = vector.shape_cast %40 : vector<1x1x16xf32> to vector<1x16xf32>
      %42 = vector.shape_cast %39 : vector<1x16xf32> to vector<1x1x16xf32>
      tpu.vector_store %arg7[%c0_28, %c9, %c3_29], %42 {strides = array<i32>} : memref<2x22x22xf32, #tpu.memory_space<vmem>>, vector<1x1x16xf32>,
      %c0_30 = arith.constant 0 : index
      %c112 = arith.constant 112 : index
      %43 = vector.load %arg6[%c0_30, %c112] : memref<2x256xf32, #tpu.memory_space<vmem>>, vector<1x16xf32>
      %c0_31 = arith.constant 0 : index
      %c10 = arith.constant 10 : index
      %c3_32 = arith.constant 3 : index
      %44 = vector.load %arg7[%c0_31, %c10, %c3_32] : memref<2x22x22xf32, #tpu.memory_space<vmem>>, vector<1x1x16xf32>
      %45 = vector.shape_cast %44 : vector<1x1x16xf32> to vector<1x16xf32>
      %46 = vector.shape_cast %43 : vector<1x16xf32> to vector<1x1x16xf32>
      tpu.vector_store %arg7[%c0_31, %c10, %c3_32], %46 {strides = array<i32>} : memref<2x22x22xf32, #tpu.memory_space<vmem>>, vector<1x1x16xf32>,
      %c0_33 = arith.constant 0 : index
      %c128 = arith.constant 128 : index
      %47 = vector.load %arg6[%c0_33, %c128] : memref<2x256xf32, #tpu.memory_space<vmem>>, vector<1x16xf32>
      %c0_34 = arith.constant 0 : index
      %c11 = arith.constant 11 : index
      %c3_35 = arith.constant 3 : index
      %48 = vector.load %arg7[%c0_34, %c11, %c3_35] : memref<2x22x22xf32, #tpu.memory_space<vmem>>, vector<1x1x16xf32>
      %49 = vector.shape_cast %48 : vector<1x1x16xf32> to vector<1x16xf32>
      %50 = vector.shape_cast %47 : vector<1x16xf32> to vector<1x1x16xf32>
      tpu.vector_store %arg7[%c0_34, %c11, %c3_35], %50 {strides = array<i32>} : memref<2x22x22xf32, #tpu.memory_space<vmem>>, vector<1x1x16xf32>,
      %c0_36 = arith.constant 0 : index
      %c144 = arith.constant 144 : index
      %51 = vector.load %arg6[%c0_36, %c144] : memref<2x256xf32, #tpu.memory_space<vmem>>, vector<1x16xf32>
      %c0_37 = arith.constant 0 : index
      %c12 = arith.constant 12 : index
      %c3_38 = arith.constant 3 : index
      %52 = vector.load %arg7[%c0_37, %c12, %c3_38] : memref<2x22x22xf32, #tpu.memory_space<vmem>>, vector<1x1x16xf32>
      %53 = vector.shape_cast %52 : vector<1x1x16xf32> to vector<1x16xf32>
      %54 = vector.shape_cast %51 : vector<1x16xf32> to vector<1x1x16xf32>
      tpu.vector_store %arg7[%c0_37, %c12, %c3_38], %54 {strides = array<i32>} : memref<2x22x22xf32, #tpu.memory_space<vmem>>, vector<1x1x16xf32>,
      %c0_39 = arith.constant 0 : index
      %c160 = arith.constant 160 : index
      %55 = vector.load %arg6[%c0_39, %c160] : memref<2x256xf32, #tpu.memory_space<vmem>>, vector<1x16xf32>
      %c0_40 = arith.constant 0 : index
      %c13 = arith.constant 13 : index
      %c3_41 = arith.constant 3 : index
      %56 = vector.load %arg7[%c0_40, %c13, %c3_41] : memref<2x22x22xf32, #tpu.memory_space<vmem>>, vector<1x1x16xf32>
      %57 = vector.shape_cast %56 : vector<1x1x16xf32> to vector<1x16xf32>
      %58 = vector.shape_cast %55 : vector<1x16xf32> to vector<1x1x16xf32>
      tpu.vector_store %arg7[%c0_40, %c13, %c3_41], %58 {strides = array<i32>} : memref<2x22x22xf32, #tpu.memory_space<vmem>>, vector<1x1x16xf32>,
      %c0_42 = arith.constant 0 : index
      %c176 = arith.constant 176 : index
      %59 = vector.load %arg6[%c0_42, %c176] : memref<2x256xf32, #tpu.memory_space<vmem>>, vector<1x16xf32>
      %c0_43 = arith.constant 0 : index
      %c14 = arith.constant 14 : index
      %c3_44 = arith.constant 3 : index
      %60 = vector.load %arg7[%c0_43, %c14, %c3_44] : memref<2x22x22xf32, #tpu.memory_space<vmem>>, vector<1x1x16xf32>
      %61 = vector.shape_cast %60 : vector<1x1x16xf32> to vector<1x16xf32>
      %62 = vector.shape_cast %59 : vector<1x16xf32> to vector<1x1x16xf32>
      tpu.vector_store %arg7[%c0_43, %c14, %c3_44], %62 {strides = array<i32>} : memref<2x22x22xf32, #tpu.memory_space<vmem>>, vector<1x1x16xf32>,
      %c0_45 = arith.constant 0 : index
      %c192 = arith.constant 192 : index
      %63 = vector.load %arg6[%c0_45, %c192] : memref<2x256xf32, #tpu.memory_space<vmem>>, vector<1x16xf32>
      %c0_46 = arith.constant 0 : index
      %c15 = arith.constant 15 : index
      %c3_47 = arith.constant 3 : index
      %64 = vector.load %arg7[%c0_46, %c15, %c3_47] : memref<2x22x22xf32, #tpu.memory_space<vmem>>, vector<1x1x16xf32>
      %65 = vector.shape_cast %64 : vector<1x1x16xf32> to vector<1x16xf32>
      %66 = vector.shape_cast %63 : vector<1x16xf32> to vector<1x1x16xf32>
      tpu.vector_store %arg7[%c0_46, %c15, %c3_47], %66 {strides = array<i32>} : memref<2x22x22xf32, #tpu.memory_space<vmem>>, vector<1x1x16xf32>,
      %c0_48 = arith.constant 0 : index
      %c208 = arith.constant 208 : index
      %67 = vector.load %arg6[%c0_48, %c208] : memref<2x256xf32, #tpu.memory_space<vmem>>, vector<1x16xf32>
      %c0_49 = arith.constant 0 : index
      %c16_50 = arith.constant 16 : index
      %c3_51 = arith.constant 3 : index
      %68 = vector.load %arg7[%c0_49, %c16_50, %c3_51] : memref<2x22x22xf32, #tpu.memory_space<vmem>>, vector<1x1x16xf32>
      %69 = vector.shape_cast %68 : vector<1x1x16xf32> to vector<1x16xf32>
      %70 = vector.shape_cast %67 : vector<1x16xf32> to vector<1x1x16xf32>
      tpu.vector_store %arg7[%c0_49, %c16_50, %c3_51], %70 {strides = array<i32>} : memref<2x22x22xf32, #tpu.memory_space<vmem>>, vector<1x1x16xf32>,
      %c0_52 = arith.constant 0 : index
      %c224 = arith.constant 224 : index
      %71 = vector.load %arg6[%c0_52, %c224] : memref<2x256xf32, #tpu.memory_space<vmem>>, vector<1x16xf32>
      %c0_53 = arith.constant 0 : index
      %c17 = arith.constant 17 : index
      %c3_54 = arith.constant 3 : index
      %72 = vector.load %arg7[%c0_53, %c17, %c3_54] : memref<2x22x22xf32, #tpu.memory_space<vmem>>, vector<1x1x16xf32>
      %73 = vector.shape_cast %72 : vector<1x1x16xf32> to vector<1x16xf32>
      %74 = vector.shape_cast %71 : vector<1x16xf32> to vector<1x1x16xf32>
      tpu.vector_store %arg7[%c0_53, %c17, %c3_54], %74 {strides = array<i32>} : memref<2x22x22xf32, #tpu.memory_space<vmem>>, vector<1x1x16xf32>,
      %c0_55 = arith.constant 0 : index
      %c240 = arith.constant 240 : index
      %75 = vector.load %arg6[%c0_55, %c240] : memref<2x256xf32, #tpu.memory_space<vmem>>, vector<1x16xf32>
      %c0_56 = arith.constant 0 : index
      %c18 = arith.constant 18 : index
      %c3_57 = arith.constant 3 : index
      %76 = vector.load %arg7[%c0_56, %c18, %c3_57] : memref<2x22x22xf32, #tpu.memory_space<vmem>>, vector<1x1x16xf32>
      %77 = vector.shape_cast %76 : vector<1x1x16xf32> to vector<1x16xf32>
      %78 = vector.shape_cast %75 : vector<1x16xf32> to vector<1x1x16xf32>
      tpu.vector_store %arg7[%c0_56, %c18, %c3_57], %78 {strides = array<i32>} : memref<2x22x22xf32, #tpu.memory_space<vmem>>, vector<1x1x16xf32>,
      %c1 = arith.constant 1 : index
      %c0_58 = arith.constant 0 : index
      %79 = vector.load %arg6[%c1, %c0_58] : memref<2x256xf32, #tpu.memory_space<vmem>>, vector<1x16xf32>
      %c1_59 = arith.constant 1 : index
      %c3_60 = arith.constant 3 : index
      %c3_61 = arith.constant 3 : index
      %80 = vector.load %arg7[%c1_59, %c3_60, %c3_61] : memref<2x22x22xf32, #tpu.memory_space<vmem>>, vector<1x1x16xf32>
      %81 = vector.shape_cast %80 : vector<1x1x16xf32> to vector<1x16xf32>
      %82 = vector.shape_cast %79 : vector<1x16xf32> to vector<1x1x16xf32>
      tpu.vector_store %arg7[%c1_59, %c3_60, %c3_61], %82 {strides = array<i32>} : memref<2x22x22xf32, #tpu.memory_space<vmem>>, vector<1x1x16xf32>,
      %c1_62 = arith.constant 1 : index
      %c16_63 = arith.constant 16 : index
      %83 = vector.load %arg6[%c1_62, %c16_63] : memref<2x256xf32, #tpu.memory_space<vmem>>, vector<1x16xf32>
      %c1_64 = arith.constant 1 : index
      %c4_65 = arith.constant 4 : index
      %c3_66 = arith.constant 3 : index
      %84 = vector.load %arg7[%c1_64, %c4_65, %c3_66] : memref<2x22x22xf32, #tpu.memory_space<vmem>>, vector<1x1x16xf32>
      %85 = vector.shape_cast %84 : vector<1x1x16xf32> to vector<1x16xf32>
      %86 = vector.shape_cast %83 : vector<1x16xf32> to vector<1x1x16xf32>
      tpu.vector_store %arg7[%c1_64, %c4_65, %c3_66], %86 {strides = array<i32>} : memref<2x22x22xf32, #tpu.memory_space<vmem>>, vector<1x1x16xf32>,
      %c1_67 = arith.constant 1 : index
      %c32_68 = arith.constant 32 : index
      %87 = vector.load %arg6[%c1_67, %c32_68] : memref<2x256xf32, #tpu.memory_space<vmem>>, vector<1x16xf32>
      %c1_69 = arith.constant 1 : index
      %c5_70 = arith.constant 5 : index
      %c3_71 = arith.constant 3 : index
      %88 = vector.load %arg7[%c1_69, %c5_70, %c3_71] : memref<2x22x22xf32, #tpu.memory_space<vmem>>, vector<1x1x16xf32>
      %89 = vector.shape_cast %88 : vector<1x1x16xf32> to vector<1x16xf32>
      %90 = vector.shape_cast %87 : vector<1x16xf32> to vector<1x1x16xf32>
      tpu.vector_store %arg7[%c1_69, %c5_70, %c3_71], %90 {strides = array<i32>} : memref<2x22x22xf32, #tpu.memory_space<vmem>>, vector<1x1x16xf32>,
      %c1_72 = arith.constant 1 : index
      %c48_73 = arith.constant 48 : index
      %91 = vector.load %arg6[%c1_72, %c48_73] : memref<2x256xf32, #tpu.memory_space<vmem>>, vector<1x16xf32>
      %c1_74 = arith.constant 1 : index
      %c6_75 = arith.constant 6 : index
      %c3_76 = arith.constant 3 : index
      %92 = vector.load %arg7[%c1_74, %c6_75, %c3_76] : memref<2x22x22xf32, #tpu.memory_space<vmem>>, vector<1x1x16xf32>
      %93 = vector.shape_cast %92 : vector<1x1x16xf32> to vector<1x16xf32>
      %94 = vector.shape_cast %91 : vector<1x16xf32> to vector<1x1x16xf32>
      tpu.vector_store %arg7[%c1_74, %c6_75, %c3_76], %94 {strides = array<i32>} : memref<2x22x22xf32, #tpu.memory_space<vmem>>, vector<1x1x16xf32>,
      %c1_77 = arith.constant 1 : index
      %c64_78 = arith.constant 64 : index
      %95 = vector.load %arg6[%c1_77, %c64_78] : memref<2x256xf32, #tpu.memory_space<vmem>>, vector<1x16xf32>
      %c1_79 = arith.constant 1 : index
      %c7_80 = arith.constant 7 : index
      %c3_81 = arith.constant 3 : index
      %96 = vector.load %arg7[%c1_79, %c7_80, %c3_81] : memref<2x22x22xf32, #tpu.memory_space<vmem>>, vector<1x1x16xf32>
      %97 = vector.shape_cast %96 : vector<1x1x16xf32> to vector<1x16xf32>
      %98 = vector.shape_cast %95 : vector<1x16xf32> to vector<1x1x16xf32>
      tpu.vector_store %arg7[%c1_79, %c7_80, %c3_81], %98 {strides = array<i32>} : memref<2x22x22xf32, #tpu.memory_space<vmem>>, vector<1x1x16xf32>,
      %c1_82 = arith.constant 1 : index
      %c80_83 = arith.constant 80 : index
      %99 = vector.load %arg6[%c1_82, %c80_83] : memref<2x256xf32, #tpu.memory_space<vmem>>, vector<1x16xf32>
      %c1_84 = arith.constant 1 : index
      %c8_85 = arith.constant 8 : index
      %c3_86 = arith.constant 3 : index
      %100 = vector.load %arg7[%c1_84, %c8_85, %c3_86] : memref<2x22x22xf32, #tpu.memory_space<vmem>>, vector<1x1x16xf32>
      %101 = vector.shape_cast %100 : vector<1x1x16xf32> to vector<1x16xf32>
      %102 = vector.shape_cast %99 : vector<1x16xf32> to vector<1x1x16xf32>
      tpu.vector_store %arg7[%c1_84, %c8_85, %c3_86], %102 {strides = array<i32>} : memref<2x22x22xf32, #tpu.memory_space<vmem>>, vector<1x1x16xf32>,
      %c1_87 = arith.constant 1 : index
      %c96_88 = arith.constant 96 : index
      %103 = vector.load %arg6[%c1_87, %c96_88] : memref<2x256xf32, #tpu.memory_space<vmem>>, vector<1x16xf32>
      %c1_89 = arith.constant 1 : index
      %c9_90 = arith.constant 9 : index
      %c3_91 = arith.constant 3 : index
      %104 = vector.load %arg7[%c1_89, %c9_90, %c3_91] : memref<2x22x22xf32, #tpu.memory_space<vmem>>, vector<1x1x16xf32>
      %105 = vector.shape_cast %104 : vector<1x1x16xf32> to vector<1x16xf32>
      %106 = vector.shape_cast %103 : vector<1x16xf32> to vector<1x1x16xf32>
      tpu.vector_store %arg7[%c1_89, %c9_90, %c3_91], %106 {strides = array<i32>} : memref<2x22x22xf32, #tpu.memory_space<vmem>>, vector<1x1x16xf32>,
      %c1_92 = arith.constant 1 : index
      %c112_93 = arith.constant 112 : index
      %107 = vector.load %arg6[%c1_92, %c112_93] : memref<2x256xf32, #tpu.memory_space<vmem>>, vector<1x16xf32>
      %c1_94 = arith.constant 1 : index
      %c10_95 = arith.constant 10 : index
      %c3_96 = arith.constant 3 : index
      %108 = vector.load %arg7[%c1_94, %c10_95, %c3_96] : memref<2x22x22xf32, #tpu.memory_space<vmem>>, vector<1x1x16xf32>
      %109 = vector.shape_cast %108 : vector<1x1x16xf32> to vector<1x16xf32>
      %110 = vector.shape_cast %107 : vector<1x16xf32> to vector<1x1x16xf32>
      tpu.vector_store %arg7[%c1_94, %c10_95, %c3_96], %110 {strides = array<i32>} : memref<2x22x22xf32, #tpu.memory_space<vmem>>, vector<1x1x16xf32>,
      %c1_97 = arith.constant 1 : index
      %c128_98 = arith.constant 128 : index
      %111 = vector.load %arg6[%c1_97, %c128_98] : memref<2x256xf32, #tpu.memory_space<vmem>>, vector<1x16xf32>
      %c1_99 = arith.constant 1 : index
      %c11_100 = arith.constant 11 : index
      %c3_101 = arith.constant 3 : index
      %112 = vector.load %arg7[%c1_99, %c11_100, %c3_101] : memref<2x22x22xf32, #tpu.memory_space<vmem>>, vector<1x1x16xf32>
      %113 = vector.shape_cast %112 : vector<1x1x16xf32> to vector<1x16xf32>
      %114 = vector.shape_cast %111 : vector<1x16xf32> to vector<1x1x16xf32>
      tpu.vector_store %arg7[%c1_99, %c11_100, %c3_101], %114 {strides = array<i32>} : memref<2x22x22xf32, #tpu.memory_space<vmem>>, vector<1x1x16xf32>,
      %c1_102 = arith.constant 1 : index
      %c144_103 = arith.constant 144 : index
      %115 = vector.load %arg6[%c1_102, %c144_103] : memref<2x256xf32, #tpu.memory_space<vmem>>, vector<1x16xf32>
      %c1_104 = arith.constant 1 : index
      %c12_105 = arith.constant 12 : index
      %c3_106 = arith.constant 3 : index
      %116 = vector.load %arg7[%c1_104, %c12_105, %c3_106] : memref<2x22x22xf32, #tpu.memory_space<vmem>>, vector<1x1x16xf32>
      %117 = vector.shape_cast %116 : vector<1x1x16xf32> to vector<1x16xf32>
      %118 = vector.shape_cast %115 : vector<1x16xf32> to vector<1x1x16xf32>
      tpu.vector_store %arg7[%c1_104, %c12_105, %c3_106], %118 {strides = array<i32>} : memref<2x22x22xf32, #tpu.memory_space<vmem>>, vector<1x1x16xf32>,
      %c1_107 = arith.constant 1 : index
      %c160_108 = arith.constant 160 : index
      %119 = vector.load %arg6[%c1_107, %c160_108] : memref<2x256xf32, #tpu.memory_space<vmem>>, vector<1x16xf32>
      %c1_109 = arith.constant 1 : index
      %c13_110 = arith.constant 13 : index
      %c3_111 = arith.constant 3 : index
      %120 = vector.load %arg7[%c1_109, %c13_110, %c3_111] : memref<2x22x22xf32, #tpu.memory_space<vmem>>, vector<1x1x16xf32>
      %121 = vector.shape_cast %120 : vector<1x1x16xf32> to vector<1x16xf32>
      %122 = vector.shape_cast %119 : vector<1x16xf32> to vector<1x1x16xf32>
      tpu.vector_store %arg7[%c1_109, %c13_110, %c3_111], %122 {strides = array<i32>} : memref<2x22x22xf32, #tpu.memory_space<vmem>>, vector<1x1x16xf32>,
      %c1_112 = arith.constant 1 : index
      %c176_113 = arith.constant 176 : index
      %123 = vector.load %arg6[%c1_112, %c176_113] : memref<2x256xf32, #tpu.memory_space<vmem>>, vector<1x16xf32>
      %c1_114 = arith.constant 1 : index
      %c14_115 = arith.constant 14 : index
      %c3_116 = arith.constant 3 : index
      %124 = vector.load %arg7[%c1_114, %c14_115, %c3_116] : memref<2x22x22xf32, #tpu.memory_space<vmem>>, vector<1x1x16xf32>
      %125 = vector.shape_cast %124 : vector<1x1x16xf32> to vector<1x16xf32>
      %126 = vector.shape_cast %123 : vector<1x16xf32> to vector<1x1x16xf32>
      tpu.vector_store %arg7[%c1_114, %c14_115, %c3_116], %126 {strides = array<i32>} : memref<2x22x22xf32, #tpu.memory_space<vmem>>, vector<1x1x16xf32>,
      %c1_117 = arith.constant 1 : index
      %c192_118 = arith.constant 192 : index
      %127 = vector.load %arg6[%c1_117, %c192_118] : memref<2x256xf32, #tpu.memory_space<vmem>>, vector<1x16xf32>
      %c1_119 = arith.constant 1 : index
      %c15_120 = arith.constant 15 : index
      %c3_121 = arith.constant 3 : index
      %128 = vector.load %arg7[%c1_119, %c15_120, %c3_121] : memref<2x22x22xf32, #tpu.memory_space<vmem>>, vector<1x1x16xf32>
      %129 = vector.shape_cast %128 : vector<1x1x16xf32> to vector<1x16xf32>
      %130 = vector.shape_cast %127 : vector<1x16xf32> to vector<1x1x16xf32>
      tpu.vector_store %arg7[%c1_119, %c15_120, %c3_121], %130 {strides = array<i32>} : memref<2x22x22xf32, #tpu.memory_space<vmem>>, vector<1x1x16xf32>,
      %c1_122 = arith.constant 1 : index
      %c208_123 = arith.constant 208 : index
      %131 = vector.load %arg6[%c1_122, %c208_123] : memref<2x256xf32, #tpu.memory_space<vmem>>, vector<1x16xf32>
      %c1_124 = arith.constant 1 : index
      %c16_125 = arith.constant 16 : index
      %c3_126 = arith.constant 3 : index
      %132 = vector.load %arg7[%c1_124, %c16_125, %c3_126] : memref<2x22x22xf32, #tpu.memory_space<vmem>>, vector<1x1x16xf32>
      %133 = vector.shape_cast %132 : vector<1x1x16xf32> to vector<1x16xf32>
      %134 = vector.shape_cast %131 : vector<1x16xf32> to vector<1x1x16xf32>
      tpu.vector_store %arg7[%c1_124, %c16_125, %c3_126], %134 {strides = array<i32>} : memref<2x22x22xf32, #tpu.memory_space<vmem>>, vector<1x1x16xf32>,
      %c1_127 = arith.constant 1 : index
      %c224_128 = arith.constant 224 : index
      %135 = vector.load %arg6[%c1_127, %c224_128] : memref<2x256xf32, #tpu.memory_space<vmem>>, vector<1x16xf32>
      %c1_129 = arith.constant 1 : index
      %c17_130 = arith.constant 17 : index
      %c3_131 = arith.constant 3 : index
      %136 = vector.load %arg7[%c1_129, %c17_130, %c3_131] : memref<2x22x22xf32, #tpu.memory_space<vmem>>, vector<1x1x16xf32>
      %137 = vector.shape_cast %136 : vector<1x1x16xf32> to vector<1x16xf32>
      %138 = vector.shape_cast %135 : vector<1x16xf32> to vector<1x1x16xf32>
      tpu.vector_store %arg7[%c1_129, %c17_130, %c3_131], %138 {strides = array<i32>} : memref<2x22x22xf32, #tpu.memory_space<vmem>>, vector<1x1x16xf32>,
      %c1_132 = arith.constant 1 : index
      %c240_133 = arith.constant 240 : index
      %139 = vector.load %arg6[%c1_132, %c240_133] : memref<2x256xf32, #tpu.memory_space<vmem>>, vector<1x16xf32>
      %c1_134 = arith.constant 1 : index
      %c18_135 = arith.constant 18 : index
      %c3_136 = arith.constant 3 : index
      %140 = vector.load %arg7[%c1_134, %c18_135, %c3_136] : memref<2x22x22xf32, #tpu.memory_space<vmem>>, vector<1x1x16xf32>
      %141 = vector.shape_cast %140 : vector<1x1x16xf32> to vector<1x16xf32>
      %142 = vector.shape_cast %139 : vector<1x16xf32> to vector<1x1x16xf32>
      tpu.vector_store %arg7[%c1_134, %c18_135, %c3_136], %142 {strides = array<i32>} : memref<2x22x22xf32, #tpu.memory_space<vmem>>, vector<1x1x16xf32>,
      %cst_137 = arith.constant 0.000000e+00 : f32
      %143 = vector.broadcast %cst_137 : f32 to vector<16x22xf32>
      %cst_138 = arith.constant 0.000000e+00 : f32
      %144 = vector.broadcast %cst_138 : f32 to vector<16x22xf32>
      %cst_139 = arith.constant 0.000000e+00 : f32
      %145 = vector.broadcast %cst_139 : f32 to vector<16x22xf32>
      %cst_140 = arith.constant 0.000000e+00 : f32
      %146 = vector.broadcast %cst_140 : f32 to vector<16x22xf32>
      %cst_141 = arith.constant 0.000000e+00 : f32
      %147 = vector.broadcast %cst_141 : f32 to vector<16x22xf32>
      %cst_142 = arith.constant 0.000000e+00 : f32
      %148 = vector.broadcast %cst_142 : f32 to vector<16x22xf32>
      %cst_143 = arith.constant 0.000000e+00 : f32
      %149 = vector.broadcast %cst_143 : f32 to vector<16x22xf32>
      %c0_144 = arith.constant 0 : index
      %c0_145 = arith.constant 0 : index
      %c0_146 = arith.constant 0 : index
      %150 = vector.load %arg7[%c0_144, %c0_145, %c0_146] : memref<2x22x22xf32, #tpu.memory_space<vmem>>, vector<1x16x22xf32>
      %151 = vector.shape_cast %150 : vector<1x16x22xf32> to vector<16x22xf32>
      %c0_147 = arith.constant 0 : index
      %152 = memref.load %arg3[%c0_147] : memref<98xf32, #tpu.memory_space<smem>>
      %153 = vector.broadcast %152 : f32 to vector<16x22xf32>
      %154 = arith.mulf %153, %151 : vector<16x22xf32>
      %155 = arith.addf %143, %154 : vector<16x22xf32>
      %c1_148 = arith.constant 1 : index
      %156 = memref.load %arg3[%c1_148] : memref<98xf32, #tpu.memory_space<smem>>
      %157 = vector.broadcast %156 : f32 to vector<16x22xf32>
      %158 = arith.mulf %157, %151 : vector<16x22xf32>
      %159 = arith.addf %144, %158 : vector<16x22xf32>
      %c2 = arith.constant 2 : index
      %160 = memref.load %arg3[%c2] : memref<98xf32, #tpu.memory_space<smem>>
      %161 = vector.broadcast %160 : f32 to vector<16x22xf32>
      %162 = arith.mulf %161, %151 : vector<16x22xf32>
      %163 = arith.addf %145, %162 : vector<16x22xf32>
      %c3_149 = arith.constant 3 : index
      %164 = memref.load %arg3[%c3_149] : memref<98xf32, #tpu.memory_space<smem>>
      %165 = vector.broadcast %164 : f32 to vector<16x22xf32>
      %166 = arith.mulf %165, %151 : vector<16x22xf32>
      %167 = arith.addf %146, %166 : vector<16x22xf32>
      %c4_150 = arith.constant 4 : index
      %168 = memref.load %arg3[%c4_150] : memref<98xf32, #tpu.memory_space<smem>>
      %169 = vector.broadcast %168 : f32 to vector<16x22xf32>
      %170 = arith.mulf %169, %151 : vector<16x22xf32>
      %171 = arith.addf %147, %170 : vector<16x22xf32>
      %c5_151 = arith.constant 5 : index
      %172 = memref.load %arg3[%c5_151] : memref<98xf32, #tpu.memory_space<smem>>
      %173 = vector.broadcast %172 : f32 to vector<16x22xf32>
      %174 = arith.mulf %173, %151 : vector<16x22xf32>
      %175 = arith.addf %148, %174 : vector<16x22xf32>
      %c6_152 = arith.constant 6 : index
      %176 = memref.load %arg3[%c6_152] : memref<98xf32, #tpu.memory_space<smem>>
      %177 = vector.broadcast %176 : f32 to vector<16x22xf32>
      %178 = arith.mulf %177, %151 : vector<16x22xf32>
      %179 = arith.addf %149, %178 : vector<16x22xf32>
      %c0_153 = arith.constant 0 : index
      %c1_154 = arith.constant 1 : index
      %c0_155 = arith.constant 0 : index
      %180 = vector.load %arg7[%c0_153, %c1_154, %c0_155] : memref<2x22x22xf32, #tpu.memory_space<vmem>>, vector<1x16x22xf32>
      %181 = vector.shape_cast %180 : vector<1x16x22xf32> to vector<16x22xf32>
      %c7_156 = arith.constant 7 : index
      %182 = memref.load %arg3[%c7_156] : memref<98xf32, #tpu.memory_space<smem>>
      %183 = vector.broadcast %182 : f32 to vector<16x22xf32>
      %184 = arith.mulf %183, %181 : vector<16x22xf32>
      %185 = arith.addf %155, %184 : vector<16x22xf32>
      %c8_157 = arith.constant 8 : index
      %186 = memref.load %arg3[%c8_157] : memref<98xf32, #tpu.memory_space<smem>>
      %187 = vector.broadcast %186 : f32 to vector<16x22xf32>
      %188 = arith.mulf %187, %181 : vector<16x22xf32>
      %189 = arith.addf %159, %188 : vector<16x22xf32>
      %c9_158 = arith.constant 9 : index
      %190 = memref.load %arg3[%c9_158] : memref<98xf32, #tpu.memory_space<smem>>
      %191 = vector.broadcast %190 : f32 to vector<16x22xf32>
      %192 = arith.mulf %191, %181 : vector<16x22xf32>
      %193 = arith.addf %163, %192 : vector<16x22xf32>
      %c10_159 = arith.constant 10 : index
      %194 = memref.load %arg3[%c10_159] : memref<98xf32, #tpu.memory_space<smem>>
      %195 = vector.broadcast %194 : f32 to vector<16x22xf32>
      %196 = arith.mulf %195, %181 : vector<16x22xf32>
      %197 = arith.addf %167, %196 : vector<16x22xf32>
      %c11_160 = arith.constant 11 : index
      %198 = memref.load %arg3[%c11_160] : memref<98xf32, #tpu.memory_space<smem>>
      %199 = vector.broadcast %198 : f32 to vector<16x22xf32>
      %200 = arith.mulf %199, %181 : vector<16x22xf32>
      %201 = arith.addf %171, %200 : vector<16x22xf32>
      %c12_161 = arith.constant 12 : index
      %202 = memref.load %arg3[%c12_161] : memref<98xf32, #tpu.memory_space<smem>>
      %203 = vector.broadcast %202 : f32 to vector<16x22xf32>
      %204 = arith.mulf %203, %181 : vector<16x22xf32>
      %205 = arith.addf %175, %204 : vector<16x22xf32>
      %c13_162 = arith.constant 13 : index
      %206 = memref.load %arg3[%c13_162] : memref<98xf32, #tpu.memory_space<smem>>
      %207 = vector.broadcast %206 : f32 to vector<16x22xf32>
      %208 = arith.mulf %207, %181 : vector<16x22xf32>
      %209 = arith.addf %179, %208 : vector<16x22xf32>
      %c0_163 = arith.constant 0 : index
      %c2_164 = arith.constant 2 : index
      %c0_165 = arith.constant 0 : index
      %210 = vector.load %arg7[%c0_163, %c2_164, %c0_165] : memref<2x22x22xf32, #tpu.memory_space<vmem>>, vector<1x16x22xf32>
      %211 = vector.shape_cast %210 : vector<1x16x22xf32> to vector<16x22xf32>
      %c14_166 = arith.constant 14 : index
      %212 = memref.load %arg3[%c14_166] : memref<98xf32, #tpu.memory_space<smem>>
      %213 = vector.broadcast %212 : f32 to vector<16x22xf32>
      %214 = arith.mulf %213, %211 : vector<16x22xf32>
      %215 = arith.addf %185, %214 : vector<16x22xf32>
      %c15_167 = arith.constant 15 : index
      %216 = memref.load %arg3[%c15_167] : memref<98xf32, #tpu.memory_space<smem>>
      %217 = vector.broadcast %216 : f32 to vector<16x22xf32>
      %218 = arith.mulf %217, %211 : vector<16x22xf32>
      %219 = arith.addf %189, %218 : vector<16x22xf32>
      %c16_168 = arith.constant 16 : index
      %220 = memref.load %arg3[%c16_168] : memref<98xf32, #tpu.memory_space<smem>>
      %221 = vector.broadcast %220 : f32 to vector<16x22xf32>
      %222 = arith.mulf %221, %211 : vector<16x22xf32>
      %223 = arith.addf %193, %222 : vector<16x22xf32>
      %c17_169 = arith.constant 17 : index
      %224 = memref.load %arg3[%c17_169] : memref<98xf32, #tpu.memory_space<smem>>
      %225 = vector.broadcast %224 : f32 to vector<16x22xf32>
      %226 = arith.mulf %225, %211 : vector<16x22xf32>
      %227 = arith.addf %197, %226 : vector<16x22xf32>
      %c18_170 = arith.constant 18 : index
      %228 = memref.load %arg3[%c18_170] : memref<98xf32, #tpu.memory_space<smem>>
      %229 = vector.broadcast %228 : f32 to vector<16x22xf32>
      %230 = arith.mulf %229, %211 : vector<16x22xf32>
      %231 = arith.addf %201, %230 : vector<16x22xf32>
      %c19 = arith.constant 19 : index
      %232 = memref.load %arg3[%c19] : memref<98xf32, #tpu.memory_space<smem>>
      %233 = vector.broadcast %232 : f32 to vector<16x22xf32>
      %234 = arith.mulf %233, %211 : vector<16x22xf32>
      %235 = arith.addf %205, %234 : vector<16x22xf32>
      %c20 = arith.constant 20 : index
      %236 = memref.load %arg3[%c20] : memref<98xf32, #tpu.memory_space<smem>>
      %237 = vector.broadcast %236 : f32 to vector<16x22xf32>
      %238 = arith.mulf %237, %211 : vector<16x22xf32>
      %239 = arith.addf %209, %238 : vector<16x22xf32>
      %c0_171 = arith.constant 0 : index
      %c3_172 = arith.constant 3 : index
      %c0_173 = arith.constant 0 : index
      %240 = vector.load %arg7[%c0_171, %c3_172, %c0_173] : memref<2x22x22xf32, #tpu.memory_space<vmem>>, vector<1x16x22xf32>
      %241 = vector.shape_cast %240 : vector<1x16x22xf32> to vector<16x22xf32>
      %c21 = arith.constant 21 : index
      %242 = memref.load %arg3[%c21] : memref<98xf32, #tpu.memory_space<smem>>
      %243 = vector.broadcast %242 : f32 to vector<16x22xf32>
      %244 = arith.mulf %243, %241 : vector<16x22xf32>
      %245 = arith.addf %215, %244 : vector<16x22xf32>
      %c22 = arith.constant 22 : index
      %246 = memref.load %arg3[%c22] : memref<98xf32, #tpu.memory_space<smem>>
      %247 = vector.broadcast %246 : f32 to vector<16x22xf32>
      %248 = arith.mulf %247, %241 : vector<16x22xf32>
      %249 = arith.addf %219, %248 : vector<16x22xf32>
      %c23 = arith.constant 23 : index
      %250 = memref.load %arg3[%c23] : memref<98xf32, #tpu.memory_space<smem>>
      %251 = vector.broadcast %250 : f32 to vector<16x22xf32>
      %252 = arith.mulf %251, %241 : vector<16x22xf32>
      %253 = arith.addf %223, %252 : vector<16x22xf32>
      %c24 = arith.constant 24 : index
      %254 = memref.load %arg3[%c24] : memref<98xf32, #tpu.memory_space<smem>>
      %255 = vector.broadcast %254 : f32 to vector<16x22xf32>
      %256 = arith.mulf %255, %241 : vector<16x22xf32>
      %257 = arith.addf %227, %256 : vector<16x22xf32>
      %c25 = arith.constant 25 : index
      %258 = memref.load %arg3[%c25] : memref<98xf32, #tpu.memory_space<smem>>
      %259 = vector.broadcast %258 : f32 to vector<16x22xf32>
      %260 = arith.mulf %259, %241 : vector<16x22xf32>
      %261 = arith.addf %231, %260 : vector<16x22xf32>
      %c26 = arith.constant 26 : index
      %262 = memref.load %arg3[%c26] : memref<98xf32, #tpu.memory_space<smem>>
      %263 = vector.broadcast %262 : f32 to vector<16x22xf32>
      %264 = arith.mulf %263, %241 : vector<16x22xf32>
      %265 = arith.addf %235, %264 : vector<16x22xf32>
      %c27 = arith.constant 27 : index
      %266 = memref.load %arg3[%c27] : memref<98xf32, #tpu.memory_space<smem>>
      %267 = vector.broadcast %266 : f32 to vector<16x22xf32>
      %268 = arith.mulf %267, %241 : vector<16x22xf32>
      %269 = arith.addf %239, %268 : vector<16x22xf32>
      %c0_174 = arith.constant 0 : index
      %c4_175 = arith.constant 4 : index
      %c0_176 = arith.constant 0 : index
      %270 = vector.load %arg7[%c0_174, %c4_175, %c0_176] : memref<2x22x22xf32, #tpu.memory_space<vmem>>, vector<1x16x22xf32>
      %271 = vector.shape_cast %270 : vector<1x16x22xf32> to vector<16x22xf32>
      %c28 = arith.constant 28 : index
      %272 = memref.load %arg3[%c28] : memref<98xf32, #tpu.memory_space<smem>>
      %273 = vector.broadcast %272 : f32 to vector<16x22xf32>
      %274 = arith.mulf %273, %271 : vector<16x22xf32>
      %275 = arith.addf %245, %274 : vector<16x22xf32>
      %c29 = arith.constant 29 : index
      %276 = memref.load %arg3[%c29] : memref<98xf32, #tpu.memory_space<smem>>
      %277 = vector.broadcast %276 : f32 to vector<16x22xf32>
      %278 = arith.mulf %277, %271 : vector<16x22xf32>
      %279 = arith.addf %249, %278 : vector<16x22xf32>
      %c30 = arith.constant 30 : index
      %280 = memref.load %arg3[%c30] : memref<98xf32, #tpu.memory_space<smem>>
      %281 = vector.broadcast %280 : f32 to vector<16x22xf32>
      %282 = arith.mulf %281, %271 : vector<16x22xf32>
      %283 = arith.addf %253, %282 : vector<16x22xf32>
      %c31 = arith.constant 31 : index
      %284 = memref.load %arg3[%c31] : memref<98xf32, #tpu.memory_space<smem>>
      %285 = vector.broadcast %284 : f32 to vector<16x22xf32>
      %286 = arith.mulf %285, %271 : vector<16x22xf32>
      %287 = arith.addf %257, %286 : vector<16x22xf32>
      %c32_177 = arith.constant 32 : index
      %288 = memref.load %arg3[%c32_177] : memref<98xf32, #tpu.memory_space<smem>>
      %289 = vector.broadcast %288 : f32 to vector<16x22xf32>
      %290 = arith.mulf %289, %271 : vector<16x22xf32>
      %291 = arith.addf %261, %290 : vector<16x22xf32>
      %c33 = arith.constant 33 : index
      %292 = memref.load %arg3[%c33] : memref<98xf32, #tpu.memory_space<smem>>
      %293 = vector.broadcast %292 : f32 to vector<16x22xf32>
      %294 = arith.mulf %293, %271 : vector<16x22xf32>
      %295 = arith.addf %265, %294 : vector<16x22xf32>
      %c34 = arith.constant 34 : index
      %296 = memref.load %arg3[%c34] : memref<98xf32, #tpu.memory_space<smem>>
      %297 = vector.broadcast %296 : f32 to vector<16x22xf32>
      %298 = arith.mulf %297, %271 : vector<16x22xf32>
      %299 = arith.addf %269, %298 : vector<16x22xf32>
      %c0_178 = arith.constant 0 : index
      %c5_179 = arith.constant 5 : index
      %c0_180 = arith.constant 0 : index
      %300 = vector.load %arg7[%c0_178, %c5_179, %c0_180] : memref<2x22x22xf32, #tpu.memory_space<vmem>>, vector<1x16x22xf32>
      %301 = vector.shape_cast %300 : vector<1x16x22xf32> to vector<16x22xf32>
      %c35 = arith.constant 35 : index
      %302 = memref.load %arg3[%c35] : memref<98xf32, #tpu.memory_space<smem>>
      %303 = vector.broadcast %302 : f32 to vector<16x22xf32>
      %304 = arith.mulf %303, %301 : vector<16x22xf32>
      %305 = arith.addf %275, %304 : vector<16x22xf32>
      %c36 = arith.constant 36 : index
      %306 = memref.load %arg3[%c36] : memref<98xf32, #tpu.memory_space<smem>>
      %307 = vector.broadcast %306 : f32 to vector<16x22xf32>
      %308 = arith.mulf %307, %301 : vector<16x22xf32>
      %309 = arith.addf %279, %308 : vector<16x22xf32>
      %c37 = arith.constant 37 : index
      %310 = memref.load %arg3[%c37] : memref<98xf32, #tpu.memory_space<smem>>
      %311 = vector.broadcast %310 : f32 to vector<16x22xf32>
      %312 = arith.mulf %311, %301 : vector<16x22xf32>
      %313 = arith.addf %283, %312 : vector<16x22xf32>
      %c38 = arith.constant 38 : index
      %314 = memref.load %arg3[%c38] : memref<98xf32, #tpu.memory_space<smem>>
      %315 = vector.broadcast %314 : f32 to vector<16x22xf32>
      %316 = arith.mulf %315, %301 : vector<16x22xf32>
      %317 = arith.addf %287, %316 : vector<16x22xf32>
      %c39 = arith.constant 39 : index
      %318 = memref.load %arg3[%c39] : memref<98xf32, #tpu.memory_space<smem>>
      %319 = vector.broadcast %318 : f32 to vector<16x22xf32>
      %320 = arith.mulf %319, %301 : vector<16x22xf32>
      %321 = arith.addf %291, %320 : vector<16x22xf32>
      %c40 = arith.constant 40 : index
      %322 = memref.load %arg3[%c40] : memref<98xf32, #tpu.memory_space<smem>>
      %323 = vector.broadcast %322 : f32 to vector<16x22xf32>
      %324 = arith.mulf %323, %301 : vector<16x22xf32>
      %325 = arith.addf %295, %324 : vector<16x22xf32>
      %c41 = arith.constant 41 : index
      %326 = memref.load %arg3[%c41] : memref<98xf32, #tpu.memory_space<smem>>
      %327 = vector.broadcast %326 : f32 to vector<16x22xf32>
      %328 = arith.mulf %327, %301 : vector<16x22xf32>
      %329 = arith.addf %299, %328 : vector<16x22xf32>
      %c0_181 = arith.constant 0 : index
      %c6_182 = arith.constant 6 : index
      %c0_183 = arith.constant 0 : index
      %330 = vector.load %arg7[%c0_181, %c6_182, %c0_183] : memref<2x22x22xf32, #tpu.memory_space<vmem>>, vector<1x16x22xf32>
      %331 = vector.shape_cast %330 : vector<1x16x22xf32> to vector<16x22xf32>
      %c42 = arith.constant 42 : index
      %332 = memref.load %arg3[%c42] : memref<98xf32, #tpu.memory_space<smem>>
      %333 = vector.broadcast %332 : f32 to vector<16x22xf32>
      %334 = arith.mulf %333, %331 : vector<16x22xf32>
      %335 = arith.addf %305, %334 : vector<16x22xf32>
      %c43 = arith.constant 43 : index
      %336 = memref.load %arg3[%c43] : memref<98xf32, #tpu.memory_space<smem>>
      %337 = vector.broadcast %336 : f32 to vector<16x22xf32>
      %338 = arith.mulf %337, %331 : vector<16x22xf32>
      %339 = arith.addf %309, %338 : vector<16x22xf32>
      %c44 = arith.constant 44 : index
      %340 = memref.load %arg3[%c44] : memref<98xf32, #tpu.memory_space<smem>>
      %341 = vector.broadcast %340 : f32 to vector<16x22xf32>
      %342 = arith.mulf %341, %331 : vector<16x22xf32>
      %343 = arith.addf %313, %342 : vector<16x22xf32>
      %c45 = arith.constant 45 : index
      %344 = memref.load %arg3[%c45] : memref<98xf32, #tpu.memory_space<smem>>
      %345 = vector.broadcast %344 : f32 to vector<16x22xf32>
      %346 = arith.mulf %345, %331 : vector<16x22xf32>
      %347 = arith.addf %317, %346 : vector<16x22xf32>
      %c46 = arith.constant 46 : index
      %348 = memref.load %arg3[%c46] : memref<98xf32, #tpu.memory_space<smem>>
      %349 = vector.broadcast %348 : f32 to vector<16x22xf32>
      %350 = arith.mulf %349, %331 : vector<16x22xf32>
      %351 = arith.addf %321, %350 : vector<16x22xf32>
      %c47 = arith.constant 47 : index
      %352 = memref.load %arg3[%c47] : memref<98xf32, #tpu.memory_space<smem>>
      %353 = vector.broadcast %352 : f32 to vector<16x22xf32>
      %354 = arith.mulf %353, %331 : vector<16x22xf32>
      %355 = arith.addf %325, %354 : vector<16x22xf32>
      %c48_184 = arith.constant 48 : index
      %356 = memref.load %arg3[%c48_184] : memref<98xf32, #tpu.memory_space<smem>>
      %357 = vector.broadcast %356 : f32 to vector<16x22xf32>
      %358 = arith.mulf %357, %331 : vector<16x22xf32>
      %359 = arith.addf %329, %358 : vector<16x22xf32>
      %c1_185 = arith.constant 1 : index
      %c0_186 = arith.constant 0 : index
      %c0_187 = arith.constant 0 : index
      %360 = vector.load %arg7[%c1_185, %c0_186, %c0_187] : memref<2x22x22xf32, #tpu.memory_space<vmem>>, vector<1x16x22xf32>
      %361 = vector.shape_cast %360 : vector<1x16x22xf32> to vector<16x22xf32>
      %c49 = arith.constant 49 : index
      %362 = memref.load %arg3[%c49] : memref<98xf32, #tpu.memory_space<smem>>
      %363 = vector.broadcast %362 : f32 to vector<16x22xf32>
      %364 = arith.mulf %363, %361 : vector<16x22xf32>
      %365 = arith.addf %335, %364 : vector<16x22xf32>
      %c50 = arith.constant 50 : index
      %366 = memref.load %arg3[%c50] : memref<98xf32, #tpu.memory_space<smem>>
      %367 = vector.broadcast %366 : f32 to vector<16x22xf32>
      %368 = arith.mulf %367, %361 : vector<16x22xf32>
      %369 = arith.addf %339, %368 : vector<16x22xf32>
      %c51 = arith.constant 51 : index
      %370 = memref.load %arg3[%c51] : memref<98xf32, #tpu.memory_space<smem>>
      %371 = vector.broadcast %370 : f32 to vector<16x22xf32>
      %372 = arith.mulf %371, %361 : vector<16x22xf32>
      %373 = arith.addf %343, %372 : vector<16x22xf32>
      %c52 = arith.constant 52 : index
      %374 = memref.load %arg3[%c52] : memref<98xf32, #tpu.memory_space<smem>>
      %375 = vector.broadcast %374 : f32 to vector<16x22xf32>
      %376 = arith.mulf %375, %361 : vector<16x22xf32>
      %377 = arith.addf %347, %376 : vector<16x22xf32>
      %c53 = arith.constant 53 : index
      %378 = memref.load %arg3[%c53] : memref<98xf32, #tpu.memory_space<smem>>
      %379 = vector.broadcast %378 : f32 to vector<16x22xf32>
      %380 = arith.mulf %379, %361 : vector<16x22xf32>
      %381 = arith.addf %351, %380 : vector<16x22xf32>
      %c54 = arith.constant 54 : index
      %382 = memref.load %arg3[%c54] : memref<98xf32, #tpu.memory_space<smem>>
      %383 = vector.broadcast %382 : f32 to vector<16x22xf32>
      %384 = arith.mulf %383, %361 : vector<16x22xf32>
      %385 = arith.addf %355, %384 : vector<16x22xf32>
      %c55 = arith.constant 55 : index
      %386 = memref.load %arg3[%c55] : memref<98xf32, #tpu.memory_space<smem>>
      %387 = vector.broadcast %386 : f32 to vector<16x22xf32>
      %388 = arith.mulf %387, %361 : vector<16x22xf32>
      %389 = arith.addf %359, %388 : vector<16x22xf32>
      %c1_188 = arith.constant 1 : index
      %c1_189 = arith.constant 1 : index
      %c0_190 = arith.constant 0 : index
      %390 = vector.load %arg7[%c1_188, %c1_189, %c0_190] : memref<2x22x22xf32, #tpu.memory_space<vmem>>, vector<1x16x22xf32>
      %391 = vector.shape_cast %390 : vector<1x16x22xf32> to vector<16x22xf32>
      %c56 = arith.constant 56 : index
      %392 = memref.load %arg3[%c56] : memref<98xf32, #tpu.memory_space<smem>>
      %393 = vector.broadcast %392 : f32 to vector<16x22xf32>
      %394 = arith.mulf %393, %391 : vector<16x22xf32>
      %395 = arith.addf %365, %394 : vector<16x22xf32>
      %c57 = arith.constant 57 : index
      %396 = memref.load %arg3[%c57] : memref<98xf32, #tpu.memory_space<smem>>
      %397 = vector.broadcast %396 : f32 to vector<16x22xf32>
      %398 = arith.mulf %397, %391 : vector<16x22xf32>
      %399 = arith.addf %369, %398 : vector<16x22xf32>
      %c58 = arith.constant 58 : index
      %400 = memref.load %arg3[%c58] : memref<98xf32, #tpu.memory_space<smem>>
      %401 = vector.broadcast %400 : f32 to vector<16x22xf32>
      %402 = arith.mulf %401, %391 : vector<16x22xf32>
      %403 = arith.addf %373, %402 : vector<16x22xf32>
      %c59 = arith.constant 59 : index
      %404 = memref.load %arg3[%c59] : memref<98xf32, #tpu.memory_space<smem>>
      %405 = vector.broadcast %404 : f32 to vector<16x22xf32>
      %406 = arith.mulf %405, %391 : vector<16x22xf32>
      %407 = arith.addf %377, %406 : vector<16x22xf32>
      %c60 = arith.constant 60 : index
      %408 = memref.load %arg3[%c60] : memref<98xf32, #tpu.memory_space<smem>>
      %409 = vector.broadcast %408 : f32 to vector<16x22xf32>
      %410 = arith.mulf %409, %391 : vector<16x22xf32>
      %411 = arith.addf %381, %410 : vector<16x22xf32>
      %c61 = arith.constant 61 : index
      %412 = memref.load %arg3[%c61] : memref<98xf32, #tpu.memory_space<smem>>
      %413 = vector.broadcast %412 : f32 to vector<16x22xf32>
      %414 = arith.mulf %413, %391 : vector<16x22xf32>
      %415 = arith.addf %385, %414 : vector<16x22xf32>
      %c62 = arith.constant 62 : index
      %416 = memref.load %arg3[%c62] : memref<98xf32, #tpu.memory_space<smem>>
      %417 = vector.broadcast %416 : f32 to vector<16x22xf32>
      %418 = arith.mulf %417, %391 : vector<16x22xf32>
      %419 = arith.addf %389, %418 : vector<16x22xf32>
      %c1_191 = arith.constant 1 : index
      %c2_192 = arith.constant 2 : index
      %c0_193 = arith.constant 0 : index
      %420 = vector.load %arg7[%c1_191, %c2_192, %c0_193] : memref<2x22x22xf32, #tpu.memory_space<vmem>>, vector<1x16x22xf32>
      %421 = vector.shape_cast %420 : vector<1x16x22xf32> to vector<16x22xf32>
      %c63 = arith.constant 63 : index
      %422 = memref.load %arg3[%c63] : memref<98xf32, #tpu.memory_space<smem>>
      %423 = vector.broadcast %422 : f32 to vector<16x22xf32>
      %424 = arith.mulf %423, %421 : vector<16x22xf32>
      %425 = arith.addf %395, %424 : vector<16x22xf32>
      %c64_194 = arith.constant 64 : index
      %426 = memref.load %arg3[%c64_194] : memref<98xf32, #tpu.memory_space<smem>>
      %427 = vector.broadcast %426 : f32 to vector<16x22xf32>
      %428 = arith.mulf %427, %421 : vector<16x22xf32>
      %429 = arith.addf %399, %428 : vector<16x22xf32>
      %c65 = arith.constant 65 : index
      %430 = memref.load %arg3[%c65] : memref<98xf32, #tpu.memory_space<smem>>
      %431 = vector.broadcast %430 : f32 to vector<16x22xf32>
      %432 = arith.mulf %431, %421 : vector<16x22xf32>
      %433 = arith.addf %403, %432 : vector<16x22xf32>
      %c66 = arith.constant 66 : index
      %434 = memref.load %arg3[%c66] : memref<98xf32, #tpu.memory_space<smem>>
      %435 = vector.broadcast %434 : f32 to vector<16x22xf32>
      %436 = arith.mulf %435, %421 : vector<16x22xf32>
      %437 = arith.addf %407, %436 : vector<16x22xf32>
      %c67 = arith.constant 67 : index
      %438 = memref.load %arg3[%c67] : memref<98xf32, #tpu.memory_space<smem>>
      %439 = vector.broadcast %438 : f32 to vector<16x22xf32>
      %440 = arith.mulf %439, %421 : vector<16x22xf32>
      %441 = arith.addf %411, %440 : vector<16x22xf32>
      %c68 = arith.constant 68 : index
      %442 = memref.load %arg3[%c68] : memref<98xf32, #tpu.memory_space<smem>>
      %443 = vector.broadcast %442 : f32 to vector<16x22xf32>
      %444 = arith.mulf %443, %421 : vector<16x22xf32>
      %445 = arith.addf %415, %444 : vector<16x22xf32>
      %c69 = arith.constant 69 : index
      %446 = memref.load %arg3[%c69] : memref<98xf32, #tpu.memory_space<smem>>
      %447 = vector.broadcast %446 : f32 to vector<16x22xf32>
      %448 = arith.mulf %447, %421 : vector<16x22xf32>
      %449 = arith.addf %419, %448 : vector<16x22xf32>
      %c1_195 = arith.constant 1 : index
      %c3_196 = arith.constant 3 : index
      %c0_197 = arith.constant 0 : index
      %450 = vector.load %arg7[%c1_195, %c3_196, %c0_197] : memref<2x22x22xf32, #tpu.memory_space<vmem>>, vector<1x16x22xf32>
      %451 = vector.shape_cast %450 : vector<1x16x22xf32> to vector<16x22xf32>
      %c70 = arith.constant 70 : index
      %452 = memref.load %arg3[%c70] : memref<98xf32, #tpu.memory_space<smem>>
      %453 = vector.broadcast %452 : f32 to vector<16x22xf32>
      %454 = arith.mulf %453, %451 : vector<16x22xf32>
      %455 = arith.addf %425, %454 : vector<16x22xf32>
      %c71 = arith.constant 71 : index
      %456 = memref.load %arg3[%c71] : memref<98xf32, #tpu.memory_space<smem>>
      %457 = vector.broadcast %456 : f32 to vector<16x22xf32>
      %458 = arith.mulf %457, %451 : vector<16x22xf32>
      %459 = arith.addf %429, %458 : vector<16x22xf32>
      %c72 = arith.constant 72 : index
      %460 = memref.load %arg3[%c72] : memref<98xf32, #tpu.memory_space<smem>>
      %461 = vector.broadcast %460 : f32 to vector<16x22xf32>
      %462 = arith.mulf %461, %451 : vector<16x22xf32>
      %463 = arith.addf %433, %462 : vector<16x22xf32>
      %c73 = arith.constant 73 : index
      %464 = memref.load %arg3[%c73] : memref<98xf32, #tpu.memory_space<smem>>
      %465 = vector.broadcast %464 : f32 to vector<16x22xf32>
      %466 = arith.mulf %465, %451 : vector<16x22xf32>
      %467 = arith.addf %437, %466 : vector<16x22xf32>
      %c74 = arith.constant 74 : index
      %468 = memref.load %arg3[%c74] : memref<98xf32, #tpu.memory_space<smem>>
      %469 = vector.broadcast %468 : f32 to vector<16x22xf32>
      %470 = arith.mulf %469, %451 : vector<16x22xf32>
      %471 = arith.addf %441, %470 : vector<16x22xf32>
      %c75 = arith.constant 75 : index
      %472 = memref.load %arg3[%c75] : memref<98xf32, #tpu.memory_space<smem>>
      %473 = vector.broadcast %472 : f32 to vector<16x22xf32>
      %474 = arith.mulf %473, %451 : vector<16x22xf32>
      %475 = arith.addf %445, %474 : vector<16x22xf32>
      %c76 = arith.constant 76 : index
      %476 = memref.load %arg3[%c76] : memref<98xf32, #tpu.memory_space<smem>>
      %477 = vector.broadcast %476 : f32 to vector<16x22xf32>
      %478 = arith.mulf %477, %451 : vector<16x22xf32>
      %479 = arith.addf %449, %478 : vector<16x22xf32>
      %c1_198 = arith.constant 1 : index
      %c4_199 = arith.constant 4 : index
      %c0_200 = arith.constant 0 : index
      %480 = vector.load %arg7[%c1_198, %c4_199, %c0_200] : memref<2x22x22xf32, #tpu.memory_space<vmem>>, vector<1x16x22xf32>
      %481 = vector.shape_cast %480 : vector<1x16x22xf32> to vector<16x22xf32>
      %c77 = arith.constant 77 : index
      %482 = memref.load %arg3[%c77] : memref<98xf32, #tpu.memory_space<smem>>
      %483 = vector.broadcast %482 : f32 to vector<16x22xf32>
      %484 = arith.mulf %483, %481 : vector<16x22xf32>
      %485 = arith.addf %455, %484 : vector<16x22xf32>
      %c78 = arith.constant 78 : index
      %486 = memref.load %arg3[%c78] : memref<98xf32, #tpu.memory_space<smem>>
      %487 = vector.broadcast %486 : f32 to vector<16x22xf32>
      %488 = arith.mulf %487, %481 : vector<16x22xf32>
      %489 = arith.addf %459, %488 : vector<16x22xf32>
      %c79 = arith.constant 79 : index
      %490 = memref.load %arg3[%c79] : memref<98xf32, #tpu.memory_space<smem>>
      %491 = vector.broadcast %490 : f32 to vector<16x22xf32>
      %492 = arith.mulf %491, %481 : vector<16x22xf32>
      %493 = arith.addf %463, %492 : vector<16x22xf32>
      %c80_201 = arith.constant 80 : index
      %494 = memref.load %arg3[%c80_201] : memref<98xf32, #tpu.memory_space<smem>>
      %495 = vector.broadcast %494 : f32 to vector<16x22xf32>
      %496 = arith.mulf %495, %481 : vector<16x22xf32>
      %497 = arith.addf %467, %496 : vector<16x22xf32>
      %c81 = arith.constant 81 : index
      %498 = memref.load %arg3[%c81] : memref<98xf32, #tpu.memory_space<smem>>
      %499 = vector.broadcast %498 : f32 to vector<16x22xf32>
      %500 = arith.mulf %499, %481 : vector<16x22xf32>
      %501 = arith.addf %471, %500 : vector<16x22xf32>
      %c82 = arith.constant 82 : index
      %502 = memref.load %arg3[%c82] : memref<98xf32, #tpu.memory_space<smem>>
      %503 = vector.broadcast %502 : f32 to vector<16x22xf32>
      %504 = arith.mulf %503, %481 : vector<16x22xf32>
      %505 = arith.addf %475, %504 : vector<16x22xf32>
      %c83 = arith.constant 83 : index
      %506 = memref.load %arg3[%c83] : memref<98xf32, #tpu.memory_space<smem>>
      %507 = vector.broadcast %506 : f32 to vector<16x22xf32>
      %508 = arith.mulf %507, %481 : vector<16x22xf32>
      %509 = arith.addf %479, %508 : vector<16x22xf32>
      %c1_202 = arith.constant 1 : index
      %c5_203 = arith.constant 5 : index
      %c0_204 = arith.constant 0 : index
      %510 = vector.load %arg7[%c1_202, %c5_203, %c0_204] : memref<2x22x22xf32, #tpu.memory_space<vmem>>, vector<1x16x22xf32>
      %511 = vector.shape_cast %510 : vector<1x16x22xf32> to vector<16x22xf32>
      %c84 = arith.constant 84 : index
      %512 = memref.load %arg3[%c84] : memref<98xf32, #tpu.memory_space<smem>>
      %513 = vector.broadcast %512 : f32 to vector<16x22xf32>
      %514 = arith.mulf %513, %511 : vector<16x22xf32>
      %515 = arith.addf %485, %514 : vector<16x22xf32>
      %c85 = arith.constant 85 : index
      %516 = memref.load %arg3[%c85] : memref<98xf32, #tpu.memory_space<smem>>
      %517 = vector.broadcast %516 : f32 to vector<16x22xf32>
      %518 = arith.mulf %517, %511 : vector<16x22xf32>
      %519 = arith.addf %489, %518 : vector<16x22xf32>
      %c86 = arith.constant 86 : index
      %520 = memref.load %arg3[%c86] : memref<98xf32, #tpu.memory_space<smem>>
      %521 = vector.broadcast %520 : f32 to vector<16x22xf32>
      %522 = arith.mulf %521, %511 : vector<16x22xf32>
      %523 = arith.addf %493, %522 : vector<16x22xf32>
      %c87 = arith.constant 87 : index
      %524 = memref.load %arg3[%c87] : memref<98xf32, #tpu.memory_space<smem>>
      %525 = vector.broadcast %524 : f32 to vector<16x22xf32>
      %526 = arith.mulf %525, %511 : vector<16x22xf32>
      %527 = arith.addf %497, %526 : vector<16x22xf32>
      %c88 = arith.constant 88 : index
      %528 = memref.load %arg3[%c88] : memref<98xf32, #tpu.memory_space<smem>>
      %529 = vector.broadcast %528 : f32 to vector<16x22xf32>
      %530 = arith.mulf %529, %511 : vector<16x22xf32>
      %531 = arith.addf %501, %530 : vector<16x22xf32>
      %c89 = arith.constant 89 : index
      %532 = memref.load %arg3[%c89] : memref<98xf32, #tpu.memory_space<smem>>
      %533 = vector.broadcast %532 : f32 to vector<16x22xf32>
      %534 = arith.mulf %533, %511 : vector<16x22xf32>
      %535 = arith.addf %505, %534 : vector<16x22xf32>
      %c90 = arith.constant 90 : index
      %536 = memref.load %arg3[%c90] : memref<98xf32, #tpu.memory_space<smem>>
      %537 = vector.broadcast %536 : f32 to vector<16x22xf32>
      %538 = arith.mulf %537, %511 : vector<16x22xf32>
      %539 = arith.addf %509, %538 : vector<16x22xf32>
      %c1_205 = arith.constant 1 : index
      %c6_206 = arith.constant 6 : index
      %c0_207 = arith.constant 0 : index
      %540 = vector.load %arg7[%c1_205, %c6_206, %c0_207] : memref<2x22x22xf32, #tpu.memory_space<vmem>>, vector<1x16x22xf32>
      %541 = vector.shape_cast %540 : vector<1x16x22xf32> to vector<16x22xf32>
      %c91 = arith.constant 91 : index
      %542 = memref.load %arg3[%c91] : memref<98xf32, #tpu.memory_space<smem>>
      %543 = vector.broadcast %542 : f32 to vector<16x22xf32>
      %544 = arith.mulf %543, %541 : vector<16x22xf32>
      %545 = arith.addf %515, %544 : vector<16x22xf32>
      %c92 = arith.constant 92 : index
      %546 = memref.load %arg3[%c92] : memref<98xf32, #tpu.memory_space<smem>>
      %547 = vector.broadcast %546 : f32 to vector<16x22xf32>
      %548 = arith.mulf %547, %541 : vector<16x22xf32>
      %549 = arith.addf %519, %548 : vector<16x22xf32>
      %c93 = arith.constant 93 : index
      %550 = memref.load %arg3[%c93] : memref<98xf32, #tpu.memory_space<smem>>
      %551 = vector.broadcast %550 : f32 to vector<16x22xf32>
      %552 = arith.mulf %551, %541 : vector<16x22xf32>
      %553 = arith.addf %523, %552 : vector<16x22xf32>
      %c94 = arith.constant 94 : index
      %554 = memref.load %arg3[%c94] : memref<98xf32, #tpu.memory_space<smem>>
      %555 = vector.broadcast %554 : f32 to vector<16x22xf32>
      %556 = arith.mulf %555, %541 : vector<16x22xf32>
      %557 = arith.addf %527, %556 : vector<16x22xf32>
      %c95 = arith.constant 95 : index
      %558 = memref.load %arg3[%c95] : memref<98xf32, #tpu.memory_space<smem>>
      %559 = vector.broadcast %558 : f32 to vector<16x22xf32>
      %560 = arith.mulf %559, %541 : vector<16x22xf32>
      %561 = arith.addf %531, %560 : vector<16x22xf32>
      %c96_208 = arith.constant 96 : index
      %562 = memref.load %arg3[%c96_208] : memref<98xf32, #tpu.memory_space<smem>>
      %563 = vector.broadcast %562 : f32 to vector<16x22xf32>
      %564 = arith.mulf %563, %541 : vector<16x22xf32>
      %565 = arith.addf %535, %564 : vector<16x22xf32>
      %c97 = arith.constant 97 : index
      %566 = memref.load %arg3[%c97] : memref<98xf32, #tpu.memory_space<smem>>
      %567 = vector.broadcast %566 : f32 to vector<16x22xf32>
      %568 = arith.mulf %567, %541 : vector<16x22xf32>
      %569 = arith.addf %539, %568 : vector<16x22xf32>
      %570 = vector.extract_strided_slice %545 {offsets = [0, 0], sizes = [16, 16], strides = [1, 1]} : vector<16x22xf32> to vector<16x16xf32>
      %571 = vector.extract_strided_slice %549 {offsets = [0, 1], sizes = [16, 16], strides = [1, 1]} : vector<16x22xf32> to vector<16x16xf32>
      %572 = arith.addf %570, %571 : vector<16x16xf32>
      %573 = vector.extract_strided_slice %553 {offsets = [0, 2], sizes = [16, 16], strides = [1, 1]} : vector<16x22xf32> to vector<16x16xf32>
      %574 = arith.addf %572, %573 : vector<16x16xf32>
      %575 = vector.extract_strided_slice %557 {offsets = [0, 3], sizes = [16, 16], strides = [1, 1]} : vector<16x22xf32> to vector<16x16xf32>
      %576 = arith.addf %574, %575 : vector<16x16xf32>
      %577 = vector.extract_strided_slice %561 {offsets = [0, 4], sizes = [16, 16], strides = [1, 1]} : vector<16x22xf32> to vector<16x16xf32>
      %578 = arith.addf %576, %577 : vector<16x16xf32>
      %579 = vector.extract_strided_slice %565 {offsets = [0, 5], sizes = [16, 16], strides = [1, 1]} : vector<16x22xf32> to vector<16x16xf32>
      %580 = arith.addf %578, %579 : vector<16x16xf32>
      %581 = vector.extract_strided_slice %569 {offsets = [0, 6], sizes = [16, 16], strides = [1, 1]} : vector<16x22xf32> to vector<16x16xf32>
      %582 = arith.addf %580, %581 : vector<16x16xf32>
      %c0_209 = arith.constant 0 : index
      %583 = memref.load %arg4[%c0_209] : memref<1xf32, #tpu.memory_space<smem>>
      %584 = vector.broadcast %583 : f32 to vector<16x16xf32>
      %585 = arith.addf %582, %584 : vector<16x16xf32>
      %586 = arith.negf %585 : vector<16x16xf32>
      %587 = math.exp %586 : vector<16x16xf32>
      %cst_210 = arith.constant 1.000000e+00 : f32
      %588 = vector.broadcast %cst_210 : f32 to vector<16x16xf32>
      %589 = arith.addf %588, %587 : vector<16x16xf32>
      %590 = arith.divf %588, %589 : vector<16x16xf32>
      %c0_211 = arith.constant 0 : index
      %c0_212 = arith.constant 0 : index
      %c0_213 = arith.constant 0 : index
      %c0_214 = arith.constant 0 : index
      %591 = vector.load %arg5[%c0_211, %c0_212, %c0_213, %c0_214] : memref<1x1x16x16xf32, #tpu.memory_space<vmem>>, vector<1x1x16x16xf32>
      %592 = vector.shape_cast %591 : vector<1x1x16x16xf32> to vector<16x16xf32>
      %593 = vector.shape_cast %590 : vector<16x16xf32> to vector<1x1x16x16xf32>
      tpu.vector_store %arg5[%c0_211, %c0_212, %c0_213, %c0_214], %593 {strides = array<i32>} : memref<1x1x16x16xf32, #tpu.memory_space<vmem>>, vector<1x1x16x16xf32>,
    } else {
    }
    return
  }
  func.func @transform_0(%arg0: i32, %arg1: i32) -> (i32, i32, i32) {
    %c0_i32 = arith.constant 0 : i32
    %c0_i32_0 = arith.constant 0 : i32
    return %arg0, %arg1, %c0_i32 : i32, i32, i32
  }
  func.func @transform_1(%arg0: i32, %arg1: i32) -> i32 {
    %c0_i32 = arith.constant 0 : i32
    %c0_i32_0 = arith.constant 0 : i32
    return %c0_i32 : i32
  }
  func.func @transform_2(%arg0: i32, %arg1: i32) -> i32 {
    %c0_i32 = arith.constant 0 : i32
    %c0_i32_0 = arith.constant 0 : i32
    return %c0_i32 : i32
  }
  func.func @transform_3(%arg0: i32, %arg1: i32) -> (i32, i32, i32, i32) {
    %c0_i32 = arith.constant 0 : i32
    %c0_i32_0 = arith.constant 0 : i32
    %c0_i32_1 = arith.constant 0 : i32
    %c0_i32_2 = arith.constant 0 : i32
    return %arg0, %c0_i32, %c0_i32_0, %c0_i32_1 : i32, i32, i32, i32
  }
}

</mosaic_0001>

<bundles_post_ra>
// kernel: tpu_custom_call.1
= control target key start
LH: loop header
LB: loop body
LE: loop exit
PB: predicated region body
PF: predicated region fallthrough
CT: control target
= control target key end

     0   :  { %s3158_s0 = inlined_call_operand.hbm [shape: f32[2,4,256], index: 0, kind: input, shape index: {}]   ;;  %s3159_s1 = inlined_call_operand.vmem [shape: f32[98], index: 1, kind: input, shape index: {}]   ;;  %s3160_s2 = inlined_call_operand.<no memory space> [shape: f32[1], index: 2, kind: input, shape index: {}]   ;;  %s3161_s3 = inlined_call_operand.hbm [shape: f32[2,1,16,16], index: 3, kind: output, shape index: {}]  }
   0x1   :  { %3337 = sst [smem:[#allocation107_spill]] %s3158_s0 }
   0x2   :  { %3338 = sst [smem:[#allocation108_spill]] %s3159_s1 }
   0x3   :  { %3339 = sst [smem:[#allocation109_spill]] %s3161_s3 }
   0x4   :  { %8 = sst [smem:[#allocation4]] %s3160_s2 }
   0x5   :  { %9 = vsyncpa [#allocation6], 0 }
   0x6   :  { %11 = vsyncpa [#allocation6 + $0x1], 0 }
   0x7   :  { %12 = vsyncpa [#allocation8], 0 }
   0x8   :  { %13 = vsyncpa [#allocation7], 0 }
   0x9   :  { %15 = vsyncpa [#allocation7 + $0x1], 0  ;;  %s1914_s14 = smov 0   ;;  %s1916_s15 = smov 0  }
   0xa   :  { %s1918_s16 = smov 0   ;;  %s1920_s17 = smov 0  }
   0xb   :  { %s1922_s18 = smov 0   ;;  %s1924_s19 = smov 0  }
   0xc LB: > { %3340 = sst [smem:[#allocation14_spill]] %s1848_s14  ;;  %s1487_s2 = sadd.s32 4294967295, %s1868_s19   ;;  %s1868_s19 = sphi %s1924_s19, %s21_s19   ;;  %s1864_s18 = sphi %s1922_s18, %s3727_s18   ;;  %s1860_s17 = sphi %s1920_s17, %s3726_s17   ;;  %s1856_s16 = sphi %s1918_s16, %s3725_s16   ;;  %s1852_s15 = sphi %s1916_s15, %s3724_s15   ;;  %s1848_s14 = sphi %s1914_s14, %s3723_s14  }
   0xd   : > { %3341 = sst [smem:[#allocation15_spill]] %s1852_s15  ;;  %s1488_s20 = sadd.s32 4294967294, %s1868_s19  }
   0xe   : > { %3342 = sst [smem:[#allocation16_spill]] %s1856_s16  ;;  %p55_p0 = scmp.ne.s32.totalorder %s1852_s15, %s1848_s14 }
   0xf   : > { %3343 = sst [smem:[#allocation17_spill]] %s1860_s17  ;;  %p1948_p1 = scmp.eq.s32.totalorder %s1487_s2, 0 }
  0x10   : > { %3344 = sst [smem:[#allocation18_spill]] %s1864_s18  ;;  %p1952_p2 = scmp.eq.s32.totalorder %s1487_s2, 1 }
  0x11   : > { %3345 = sst [smem:[#allocation19_spill]] %s1868_s19  ;;  %p127_p3 = scmp.eq.s32.totalorder %s1488_s20, 1 }
  0x12   : > { %s3346_s21 = scalar_select %p1948_p1, 1, 0 }
  0x13   : > { %p1958_p4 = por %p1948_p1, %p55_p0  ;;  %p1489_p5 = scmp.ge.s32.totalorder %s1868_s19, 1 }
  0x14   : > { %p1963_p6 = por %p127_p3, %p55_p0  ;;  %p134_p7 = scmp.lt.s32.totalorder %s1868_s19, 3 }
  0x15   : > { %s3348_s23 = scalar_select %p1958_p4, 1, 0 }
  0x16   : > { %s3349_s24 = scalar_select %p1963_p6, 1, 0 }
  0x17   : > { %s3351_s1 = sld [smem:[#allocation108_spill]]  ;;  %p1971_p8 = pnand %p1489_p5, %p134_p7 }
  0x18   : > { %3350 = sst [smem:[#allocation20_spill]] %s3349_s24  ;;  %s33_s30 = sadd.s32 1, %s1864_s18 }
  0x19   : > { %p1645_p10 = pneg %p1971_p8  ;;  %s42_s4 = sadd.s32 1, %s1856_s16 }
  0x1a   : > { %p35_p12 = scmp.ge.s32.totalorder %s33_s30, 2 }
  0x1b   : > { %p1980_p11 = pnand %p1645_p10, %p1948_p1 }
  0x1d   : > { %s147_s27 = sshll.u32 %s3351_s1, 4  ;;  %p1739_p0 = pneg %p1980_p11  ;;  %s148_s27 = int_to_ptr.vmem [resolvable:$true] %s147_s27 }
  0x1e   : > { %s1737_s5 = scalar_lea.vmem %s148_s27, 16  ;;  %p1745_p7 = scmp.lt.s32.totalorder %s148_s27, %s148_s27 }
  0x1f   : > { %p1738_p13 = scmp.ne.s32.totalorder %s148_s27, %s1737_s5  ;;  %p1746_p6 = scmp.lt.s32.totalorder %s1737_s5, %s1737_s5 }
  0x21   : > { %p1740_p3 = pnand %p1739_p0, %p1738_p13  ;;  %p1747_p9 = por %p1746_p6, %p1745_p7 }
  0x23   : > { %p1741_p5 = pneg %p1740_p3 }
  0x25   : > { %p1748_p4 = pnand %p1747_p9, %p1741_p5 }
  0x27   : > { %1751 = shalt.err (!%p1748_p4)
}
  0x28   : > { %s1870_s6 = smov [#allocation9]   ;;  %s3729_s30 = smov (%p35_p12, %s33_s30), 0 }
  0x29   : > { %1648 = dma.vmem_to_smem (!%p1980_p11), %s148_s27, 16, %s1870_s6, [#allocation8]  }
  0x2a   : > { %3354 = sst [smem:[#allocation21_spill]] %s3729_s30  ;;  %p49_p10 = scmp.ne.s32.totalorder %s1856_s16, %s1852_s15 }
  0x2b   : > { %p50_p6 = scmp.eq.s32.totalorder %s1868_s19, 0  ;;  %s37_s7 = ssub.s32 %s1864_s18, %s3729_s30 }
  0x2c   : > { %p1658_p4 = scmp.lt.s32.totalorder %s1868_s19, 2  ;;  %p40_p9 = scmp.eq.s32.totalorder %s37_s7, 0 }
  0x2d   : > { %p51_p13 = por %p50_p6, %p49_p10  ;;  %p2000_p0 = por %p1952_p2, %p49_p10 }
  0x2e   : > { %s161_s9 = sand.u32 1, %s1856_s16   ;;  %s1635_s12 = sshll.u32 %s1864_s18, 7 }
  0x2f   : > { %s3355_s8 = scalar_select %p2000_p0, 1, 0 }
  0x30   : > { %s2006_s10 = scalar_select %p40_p9, %s1856_s16, %s42_s4  }
  0x31   : > { %3356 = sst [smem:[#allocation22_spill]] %s3355_s8  ;;  %s1492_s11 = sshll.u32 %s161_s9, 3 }
  0x32   : > { %3357 = sst [smem:[#allocation23_spill]] %s2006_s10  ;;  %s3358_s0 = sld [smem:[#allocation107_spill]] }
  0x33   : > { %s165_s25 = scalar_lea.vmem [#allocation5], %s1492_s11  ;;  %p2016_p2 = pnand %p1658_p4, %p51_p13 }
  0x34   : > { %s175_s22 = sshll.u32 %s165_s25, 4  ;;  %s162_s27 = scalar_lea.sflag [#allocation6], %s161_s9  ;;  %s2014_s22 = int_to_ptr.vmem [resolvable:$true] %s175_s22 }
  0x35   : > { %p1754_p12 = pneg %p2016_p2 }
  0x38   : > { %s2012_s20 = scalar_lea.hbm %s3358_s0, %s1635_s12  ;;  %s1757_s6 = scalar_lea.hbm %s3358_s0, 256 }
  0x39   : > { %s1752_s29 = scalar_lea.hbm %s2012_s20, 128  ;;  %p1758_p7 = scmp.lt.u32.totalorder %s2012_s20, %s3358_s0 }
  0x3a   : > { %p1753_p11 = scmp.ne.s32.totalorder %s2012_s20, %s1752_s29  ;;  %p1759_p10 = scmp.lt.u32.totalorder %s1757_s6, %s1752_s29 }
  0x3b   : > { %p1761_p4 = scmp.lt.u32.totalorder %s1752_s29, %s2012_s20 }
  0x3c   : > { %p1755_p3 = pnand %p1754_p12, %p1753_p11  ;;  %p1760_p6 = por %p1759_p10, %p1758_p7 }
  0x3e   : > { %p1756_p5 = pneg %p1755_p3  ;;  %p1762_p9 = por %p1761_p4, %p1760_p6 }
  0x40   : > { %p1763_p13 = pnand %p1762_p9, %p1756_p5 }
  0x42   : > { %1766 = shalt.err (!%p1763_p13)
}
  0x43   : > { %s1767_s9 = scalar_lea.vmem %s2014_s22, 128  ;;  %s1871_s12 = smov [#allocation5]  }
  0x44   : > { %p1768_p11 = scmp.ne.s32.totalorder %s2014_s22, %s1767_s9  ;;  %s1772_s13 = sshll.u32 %s1871_s12, 4  ;;  %s1773_s13 = int_to_ptr.vmem [resolvable:$false] %s1772_s13 }
  0x45   : > { %s1774_s2 = scalar_lea.vmem %s1773_s13, 256  ;;  %p1775_p1 = scmp.lt.s32.totalorder %s2014_s22, %s1773_s13 }
  0x46   : > { %p1770_p3 = pnand %p1768_p11, %p1754_p12  ;;  %p1776_p7 = scmp.lt.s32.totalorder %s1774_s2, %s1767_s9 }
  0x48   : > { %p1771_p0 = pneg %p1770_p3  ;;  %p1777_p10 = por %p1776_p7, %p1775_p1 }
  0x4a   : > { %p1778_p6 = pnand %p1777_p10, %p1771_p0 }
  0x4c   : > { %1781 = shalt.err (!%p1778_p6)
}
  0x4d   : > { %1652 = dma.hbm_to_vmem [thread:$0]  (!%p2016_p2), %s2012_s20, 128, %s2014_s22, %s162_s27  }
  0x4e   : > { %184 = sbr.rel (%p1971_p8) target bundleno = 540 (0x21c), region = 32 }
  0x55   : > { %s2048_s25 = sand.u32 1, %s1852_s15   ;;  %p3361_p1 = scmp.ne.s32.totalorder %s3348_s23, 0 }
  0x56   : > { %3360 = sst [smem:[#allocation24_spill]] %s2048_s25  ;;  %s1496_s29 = sshll.u32 %s2048_s25, 3 }
  0x57   : > { %s187_s4 = scalar_lea.sflag [#allocation6], %s2048_s25  ;;  %s190_s5 = scalar_lea.vmem [#allocation5], %s1496_s29 }
  0x58   : > { %1835 = dma.done.wait (%p3361_p1), %s187_s4, 128  }
  0x59   : > { %1837 = vsyncadd (%p3361_p1), %s187_s4, 4294967168  ;;  %p3362_p0 = scmp.ne.s32.totalorder %s3346_s21, 0 }
  0x5b   : > { %1839 = dma.done.wait (%p3362_p0), [#allocation8], 16  }
  0x5c   : > { %1841 = vsyncadd (%p3362_p0), [#allocation8], 4294967280 }
  0x5d   : > { %199 = sfence }
  0x5e   : > { %v218_v0 = vld [vmem:[%s190_s5] sm:$0xff]  ;;  %vm222_vm0 = vcmask 1043456   ;;  %vm255_vm1 = vcmask 179200   ;;  %v1872_v12 = vmov 1966171168   ;;  %v269_v14 = vlaneseq  ;;  %s1874_s21 = smov 99  }
  0x5f   : > { %v220_v1 = vcombine.high %v218_v0, %v218_v0  ;;  %v223_v2 = vsel %vm222_vm0, %v218_v0, 0.0  ;;  %v237_v3 = vsel %vm222_vm0, %v218_v0, -inf  ;;  %v267_v13 = vunpack.c.l.s4 %v1872_v12  ;;  %s1875_s23 = smov 3   ;;  %s1876_s28 = smov 83  }
  0x60   : > { %v224_v4 = vrot.slane %v223_v2, 4  ;;  %v238_v5 = vrot.slane %v237_v3, 4  ;;  %v1873_v19 = vmov 0.0   ;;  %v270_v25 = vshrl.u32 %v269_v14, 7  ;;  %s1877_s20 = smov 115   ;;  %s1878_s22 = smov 51  }
  0x61   : > { %v230_v6 = vsel %vm222_vm0, %v220_v1, 0.0  ;;  %v244_v7 = vsel %vm222_vm0, %v220_v1, -inf  ;;  %256 = vst.msk [vmem:[#allocation3] sm:$0xff] %vm255_vm1, %v1873_v19  ;;  %257 = vst.msk [vmem:[#allocation3 + $0x8] sm:$0xff] %vm255_vm1, %v1873_v19  ;;  %v268_v24 = vunpack.c.0.s8 %v267_v13  ;;  %vm283_vm2 = vcmp.lt.s32.totalorder %v269_v14, 256  ;;  %s1879_s26 = smov 67  }
  0x62   : > { %v225_v8 = vadd.f32 %v224_v4, %v223_v2  ;;  %v231_v9 = vrot.slane %v230_v6, 4  ;;  %v239_v10 = vmax.f32 %v237_v3, %v238_v5  ;;  %v245_v11 = vrot.slane %v244_v7, 4  ;;  %260 = vst.msk [vmem:[#allocation3 + $0x18] sm:$0xff] %vm255_vm1, %v1873_v19  ;;  %261 = vst.msk [vmem:[#allocation3 + $0x20] sm:$0xff] %vm255_vm1, %v1873_v19  ;;  %s1880_s27 = smov 19   ;;  %s1881_s6 = smov 35  }
  0x63   : > { %v271_v35 = vsub.s32 %v268_v24, %v270_v25  ;;  %vm258_vm3 = vcmask 177152   ;;  %s2088_s7 = sld [smem:[#allocation9 + $0x1]]  ;;  %s2090_s11 = sld [smem:[#allocation9 + $0x8]]  ;;  %vm369_vm4 = vcmask 147480   ;;  %vm1374_vm5 = vcmask 130048  }
  0x64   : > { %v226_v15 = vrot.slane %v225_v8, 2  ;;  %v232_v16 = vadd.f32 %v231_v9, %v230_v6  ;;  %v240_v17 = vrot.slane %v239_v10, 2  ;;  %v246_v18 = vmax.f32 %v244_v7, %v245_v11  ;;  %259 = vst.msk [vmem:[#allocation3 + $0x10] sm:$0x3f] %vm258_vm3, %v1873_v19  ;;  %262 = vst.msk [vmem:[#allocation3 + $0x28] sm:$0x3f] %vm258_vm3, %v1873_v19 }
  0x65   : > { %s2092_s9 = sld [smem:[#allocation9 + $0x2]]  ;;  %s2094_s12 = sld [smem:[#allocation9 + $0x9]] }
  0x66   : > { %v227_v20 = vadd.f32 %v226_v15, %v225_v8  ;;  %v233_v21 = vrot.slane %v232_v16, 2  ;;  %v241_v22 = vmax.f32 %v239_v10, %v240_v17  ;;  %v247_v23 = vrot.slane %v246_v18, 2  ;;  %s2096_s13 = sld [smem:[#allocation9 + $0x3]]  ;;  %s2098_s2 = sld [smem:[#allocation9 + $0xf]] }
  0x67   : > { %s2100_s29 = sld [smem:[#allocation9 + $0xa]]  ;;  %s2102_s4 = sld [smem:[#allocation9 + $0x16]] }
  0x68   : > { %v228_v26 = vrot.slane %v227_v20, 1  ;;  %v234_v27 = vadd.f32 %v233_v21, %v232_v16  ;;  %v242_v28 = vrot.slane %v241_v22, 1  ;;  %v248_v29 = vmax.f32 %v246_v18, %v247_v23  ;;  %s2104_s5 = sld [smem:[#allocation9 + $0x10]]  ;;  %s2122_s0 = sld [smem:[#allocation9 + $0x25]] }
  0x69   : > { %3363 = sst [smem:[#allocation25_spill]] %s2088_s7  ;;  %s2124_s1 = sld [smem:[#allocation9 + $0x1f]]  ;;  %v691_v47 = vstv %s2088_s7  ;;  %v735_v48 = vstv %s2090_s11 }
  0x6a   : > { %v229_v30 = vadd.f32 %v228_v26, %v227_v20  ;;  %v235_v31 = vrot.slane %v234_v27, 1  ;;  %v243_v32 = vmax.f32 %v241_v22, %v242_v28  ;;  %v249_v33 = vrot.slane %v248_v29, 1  ;;  %3364 = sst [smem:[#allocation26_spill]] %s2090_s11  ;;  %s2126_s30 = sld [smem:[#allocation9 + $0x26]] }
  0x6b   : > { %3365 = sst [smem:[#allocation27_spill]] %s2092_s9  ;;  %s2128_s18 = sld [smem:[#allocation9 + $0x12]]  ;;  %v697_v49 = vstv %s2092_s9  ;;  %v741_v51 = vstv %s2094_s12 }
  0x6c   : > { %v236_v34 = vadd.f32 %v235_v31, %v234_v27  ;;  %v250_v36 = vmax.f32 %v248_v29, %v249_v33  ;;  %3366 = sst [smem:[#allocation28_spill]] %s2094_s12  ;;  %s2130_s10 = sld [smem:[#allocation9 + $0x2b]]  ;;  %v779_v50 = vstv %s2098_s2  ;;  %v703_v52 = vstv %s2096_s13 }
  0x6d   : > { %3367 = sst [smem:[#allocation29_spill]] %s2096_s13  ;;  %s2132_s16 = sld [smem:[#allocation9 + $0x19]]  ;;  %v747_v53 = vstv %s2100_s29  ;;  %v823_v56 = vstv %s2102_s4 }
  0x6e   : > { %v265_v37 = vcombine.low %v229_v30, %v236_v34  ;;  %v288_v38 = vcombine.low %v243_v32, %v250_v36  ;;  %3368 = sst [smem:[#allocation30_spill]] %s2098_s2  ;;  %s2134_s15 = sld [smem:[#allocation9 + $0x2c]]  ;;  %v785_v57 = vstv %s2104_s5  ;;  %v917_v2 = vstv %s2122_s0 }
  0x6f   : > { %3369 = sst [smem:[#allocation31_spill]] %s2100_s29  ;;  %s2136_s19 = sld [smem:[#allocation9 + $0x2d]]  ;;  %v879_v3 = vstv %s2124_s1 }
  0x70   : > { %v272_v39 = vrot.slane %v265_v37, %v271_v35  ;;  %v295_v40 = vrot.slane %v288_v38, %v271_v35  ;;  %3370 = sst [smem:[#allocation32_spill]] %s2102_s4  ;;  %s2138_s24 = sld [smem:[#allocation9 + $0x20]] }
  0x71   : > { %3371 = sst [smem:[#allocation33_spill]] %s2104_s5  ;;  %s2140_s14 = sld [smem:[#allocation9 + $0x27]] }
  0x72   : > { %v279_v41 = vrot.slane %v272_v39, %v271_v35  ;;  %v302_v42 = vrot.slane %v295_v40, %v271_v35  ;;  %3380 = sst [smem:[#allocation42_spill]] %s2122_s0  ;;  %s2142_s3 = sld [smem:[#allocation9 + $0x2e]]  ;;  %v955_v4 = vstv %s2130_s10 }
  0x73   : > { %3381 = sst [smem:[#allocation43_spill]] %s2124_s1  ;;  %s2146_s17 = sld [smem:[#allocation9 + $0xc]] }
  0x74   : > { %285 = vst.msk [vmem:[#allocation2] ss:$2 sm:$0x3] %vm283_vm2, %v279_v41  ;;  %305 = vst.msk [vmem:[#allocation2 + $0x1] ss:$2 sm:$0x3] %vm283_vm2, %v302_v42 }
  0x75   : > { %3382 = sst [smem:[#allocation44_spill]] %s2126_s30  ;;  %s2144_s8 = sld [smem:[#allocation9 + $0x5]] }
  0x76   : > { %3383 = sst [smem:[#allocation45_spill]] %s2128_s18  ;;  %s2148_s25 = sld [smem:[#allocation9 + $0x13]] }
  0x77   : > { %3384 = sst [smem:[#allocation46_spill]] %s2130_s10  ;;  %s2150_s18 = sld [smem:[#allocation9 + $0x1a]] }
  0x78   : > { %3385 = sst [smem:[#allocation47_spill]] %s2132_s16  ;;  %s2154_s16 = sld [smem:[#allocation9 + $0x28]] }
  0x79   : > { %3386 = sst [smem:[#allocation48_spill]] %s2134_s15  ;;  %s2152_s30 = sld [smem:[#allocation9 + $0x21]] }
  0x7a   : > { %3387 = sst [smem:[#allocation49_spill]] %s2136_s19  ;;  %s2156_s15 = sld [smem:[#allocation9 + $0x2f]] }
  0x7b   : > { %v1501_v43 = vld [vmem:[#allocation2] ss:$0 sm:$0xff]  ;;  %v1508_v44 = vld [vmem:[#allocation2 + $0x2] ss:$0 sm:$0xff]  ;;  %v1516_v45 = vld [vmem:[#allocation2 + $0x1] ss:$0 sm:$0xff]  ;;  %v3302_v15 = vstv %s2144_s8 }
  0x7c   : > { %387 = vrot.lane.b32.xlu1 %v1501_v43, %s1874_s21  ;;  %366 = vrot.lane.b32.xlu0 %v1501_v43, %s1875_s23  ;;  %v1524_v46 = vld [vmem:[#allocation2 + $0x3] ss:$0 sm:$0xff]  ;;  %3388 = sst [smem:[#allocation50_spill]] %s2138_s24  ;;  %s2158_s19 = sld [smem:[#allocation9 + $0x6]] }
  0x7d   : > { %3389 = sst [smem:[#allocation51_spill]] %s2140_s14  ;;  %s2162_s14 = sld [smem:[#allocation9 + $0x14]]  ;;  %v3323_v18 = vstv %s2150_s18 }
  0x7e   : > { %3390 = sst [smem:[#allocation52_spill]] %s2142_s3  ;;  %s2160_s24 = sld [smem:[#allocation9 + $0xd]] }
  0x7f   : > { %3391 = sst [smem:[#allocation53_spill]] %s2144_s8  ;;  %s2164_s3 = sld [smem:[#allocation9 + $0x1b]] }
  0x80   : > { %397 = vrot.lane.b32.xlu1 %v1501_v43, %s1876_s28  ;;  %377 = vrot.lane.b32.xlu0 %v1501_v43, %s1877_s20  ;;  %3392 = sst [smem:[#allocation54_spill]] %s2146_s17  ;;  %s2166_s17 = sld [smem:[#allocation9 + $0x22]] }
  0x81   : > { %3393 = sst [smem:[#allocation55_spill]] %s2148_s25  ;;  %s2210_s9 = sld [smem:[#allocation9 + $0x4e]] }
  0x82   : > { %3394 = sst [smem:[#allocation56_spill]] %s2150_s18  ;;  %s2168_s25 = sld [smem:[#allocation9 + $0x29]] }
  0x83   : > { %3395 = sst [smem:[#allocation57_spill]] %s2152_s30  ;;  %s2170_s30 = sld [smem:[#allocation9 + $0x32]] }
  0x84   : > { %417 = vrot.lane.b32.xlu1 %v1501_v43, %s1878_s22  ;;  %407 = vrot.lane.b32.xlu0 %v1501_v43, %s1879_s26  ;;  %3396 = sst [smem:[#allocation58_spill]] %s2154_s16  ;;  %s2172_s16 = sld [smem:[#allocation9 + $0x30]] }
  0x85   : > { %3397 = sst [smem:[#allocation59_spill]] %s2156_s15  ;;  %s2174_s15 = sld [smem:[#allocation9 + $0x39]] }
  0x86   : > { %3398 = sst [smem:[#allocation60_spill]] %s2158_s19  ;;  %s2176_s19 = sld [smem:[#allocation9 + $0x33]] }
  0x87   : > { %3399 = sst [smem:[#allocation61_spill]] %s2160_s24  ;;  %s2186_s24 = sld [smem:[#allocation9 + $0x40]] }
  0x88   : > { %437 = vrot.lane.b32.xlu1 %v1501_v43, %s1880_s27  ;;  %427 = vrot.lane.b32.xlu0 %v1501_v43, %s1881_s6  ;;  %3400 = sst [smem:[#allocation62_spill]] %s2162_s14  ;;  %s2178_s14 = sld [smem:[#allocation9 + $0x3a]] }
  0x89   : > { %3401 = sst [smem:[#allocation63_spill]] %s2164_s3  ;;  %s2180_s3 = sld [smem:[#allocation9 + $0x34]] }
  0x8a   : > { %3402 = sst [smem:[#allocation64_spill]] %s2166_s17  ;;  %s2182_s17 = sld [smem:[#allocation9 + $0x3b]] }
  0x8b   : > { %3403 = sst [smem:[#allocation65_spill]] %s2168_s25  ;;  %s2184_s25 = sld [smem:[#allocation9 + $0x35]] }
  0x8c   : > { %457 = vrot.lane.b32.xlu1 %v1508_v44, %s1877_s20  ;;  %447 = vrot.lane.b32.xlu0 %v1508_v44, %s1875_s23  ;;  %3404 = sst [smem:[#allocation66_spill]] %s2170_s30  ;;  %s2215_s2 = sld [smem:[#allocation9 + $0x4a]] }
  0x8d   : > { %3405 = sst [smem:[#allocation67_spill]] %s2172_s16  ;;  %s2188_s30 = sld [smem:[#allocation9 + $0x3c]] }
  0x8e   : > { %3406 = sst [smem:[#allocation68_spill]] %s2174_s15  ;;  %s2190_s16 = sld [smem:[#allocation9 + $0x47]] }
  0x8f   : > { %3407 = sst [smem:[#allocation69_spill]] %s2176_s19  ;;  %s2192_s15 = sld [smem:[#allocation9 + $0x41]] }
  0x90   : > { %477 = vrot.lane.b32.xlu1 %v1508_v44, %s1876_s28  ;;  %467 = vrot.lane.b32.xlu0 %v1508_v44, %s1874_s21  ;;  %3408 = sst [smem:[#allocation70_spill]] %s2178_s14  ;;  %s3422_s29 = sld [smem:[#allocation44_spill]] }
  0x91   : > { %3409 = sst [smem:[#allocation71_spill]] %s2180_s3  ;;  %s2197_s3 = sld [smem:[#allocation9 + $0x48]] }
  0x92   : > { %3410 = sst [smem:[#allocation72_spill]] %s2182_s17  ;;  %s3423_s13 = sld [smem:[#allocation45_spill]] }
  0x93   : > { %3411 = sst [smem:[#allocation73_spill]] %s2184_s25  ;;  %s2199_s17 = sld [smem:[#allocation9 + $0x42]] }
  0x94   : > { %497 = vrot.lane.b32.xlu1 %v1508_v44, %s1878_s22  ;;  %487 = vrot.lane.b32.xlu0 %v1508_v44, %s1879_s26  ;;  %3412 = sst [smem:[#allocation74_spill]] %s2186_s24  ;;  %s3424_s12 = sld [smem:[#allocation47_spill]] }
  0x95   : > { %3413 = sst [smem:[#allocation75_spill]] %s2188_s30  ;;  %s2222_s4 = sld [smem:[#allocation9 + $0x4f]] }
  0x96   : > { %3414 = sst [smem:[#allocation76_spill]] %s2190_s16  ;;  %s2205_s16 = sld [smem:[#allocation9 + $0x49]]  ;;  %v923_v5 = vstv %s3422_s29 }
  0x97   : > { %3415 = sst [smem:[#allocation77_spill]] %s2192_s15  ;;  %s2207_s15 = sld [smem:[#allocation9 + $0x43]] }
  0x98   : > { %517 = vrot.lane.b32.xlu1 %v1508_v44, %s1880_s27  ;;  %507 = vrot.lane.b32.xlu0 %v1508_v44, %s1881_s6  ;;  %3416 = sst [smem:[#allocation78_spill]] %s2197_s3  ;;  %s2220_s11 = sld [smem:[#allocation9 + $0x55]]  ;;  %v3304_v6 = vstv %s3423_s13 }
  0x99   : > { %3417 = sst [smem:[#allocation79_spill]] %s2199_s17  ;;  %s3429_s5 = sld [smem:[#allocation50_spill]] }
  0x9a   : > { %3420 = sst [smem:[#allocation82_spill]] %s2210_s9  ;;  %s3430_s7 = sld [smem:[#allocation51_spill]]  ;;  %v3330_v7 = vstv %s3424_s12 }
  0x9b   : > { %3421 = sst [smem:[#allocation83_spill]] %s2215_s2  ;;  %s2230_s2 = sld [smem:[#allocation9 + $0x56]] }
  0x9c   : > { %538 = vrot.lane.b32.xlu1 %v1516_v45, %s1877_s20  ;;  %527 = vrot.lane.b32.xlu0 %v1516_v45, %s1875_s23  ;;  %3418 = sst [smem:[#allocation80_spill]] %s2205_s16  ;;  %s2243_s0 = sld [smem:[#allocation9 + $0x5c]] }
  0x9d   : > { %3419 = sst [smem:[#allocation81_spill]] %s2207_s15  ;;  %s2233_s15 = sld [smem:[#allocation9 + $0x50]] }
  0x9e   : > { %3425 = sst [smem:[#allocation84_spill]] %s2220_s11  ;;  %s3439_s1 = sld [smem:[#allocation57_spill]] }
  0x9f   : > { %3426 = sst [smem:[#allocation85_spill]] %s2222_s4  ;;  %s3434_s4 = sld [smem:[#allocation52_spill]]  ;;  %v3329_v12 = vstv %s3429_s5 }
  0xa0   : > { %558 = vrot.lane.b32.xlu1 %v1516_v45, %s1876_s28  ;;  %548 = vrot.lane.b32.xlu0 %v1516_v45, %s1874_s21  ;;  %s3440_s10 = sld [smem:[#allocation58_spill]]  ;;  %s3441_s29 = sld [smem:[#allocation59_spill]]  ;;  %v3328_v13 = vstv %s3430_s7 }
  0xa1   : > { %3431 = sst [smem:[#allocation86_spill]] %s2230_s2  ;;  %s3443_s12 = sld [smem:[#allocation60_spill]] }
  0xa2   : > { %3438 = sst [smem:[#allocation90_spill]] %s2243_s0  ;;  %s3444_s13 = sld [smem:[#allocation61_spill]] }
  0xa3   : > { %3432 = sst [smem:[#allocation87_spill]] %s2233_s15  ;;  %s3451_s5 = sld [smem:[#allocation64_spill]] }
  0xa4   : > { %578 = vrot.lane.b32.xlu1 %v1516_v45, %s1878_s22  ;;  %568 = vrot.lane.b32.xlu0 %v1516_v45, %s1879_s26  ;;  %s2261_s7 = sld [smem:[#allocation9 + $0x51]]  ;;  %s3453_s0 = sld [smem:[#allocation65_spill]]  ;;  %v3326_v19 = vstv %s3439_s1 }
  0xa5   : > { %v973_v14 = vstv %s3434_s4  ;;  %s3454_s15 = sld [smem:[#allocation67_spill]]  ;;  %s2271_s2 = sld [smem:[#allocation9 + $0x4b]] }
  0xa6   : > { %v935_v20 = vstv %s3440_s10  ;;  %v3336_v21 = vstv %s3441_s29  ;;  %s2278_s10 = sld [smem:[#allocation9 + $0x5f]]  ;;  %s2309_s18 = sld [smem:[#allocation9 + $0x4c]] }
  0xa7   : > { %v3318_v22 = vstv %s3443_s12  ;;  %s2283_s1 = sld [smem:[#allocation9 + $0x37]]  ;;  %s2307_s12 = sld [smem:[#allocation9 + $0x60]] }
  0xa8   : > { %598 = vrot.lane.b32.xlu1 %v1516_v45, %s1880_s27  ;;  %588 = vrot.lane.b32.xlu0 %v1516_v45, %s1881_s6  ;;  %v3317_v23 = vstv %s3444_s13  ;;  %s2315_s3 = sld [smem:[#allocation9]]  ;;  %s2331_s11 = sld [smem:[#allocation9 + $0x53]] }
  0xa9   : > { %v3334_v29 = vstv %s3451_s5  ;;  %s2293_s5 = sld [smem:[#allocation9 + $0x3e]]  ;;  %s3509_s29 = sld [smem:[#allocation47_spill]] }
  0xaa   : > { %3450 = sst [smem:[#allocation94_spill]] %s2261_s7  ;;  %v3332_v30 = vstv %s3453_s0  ;;  %s3497_s7 = sld [smem:[#allocation45_spill]] }
  0xab   : > { %3457 = sst [smem:[#allocation97_spill]] %s2271_s2  ;;  %v3331_v31 = vstv %s3454_s15  ;;  %s3514_s17 = sld [smem:[#allocation50_spill]] }
  0xac   : > { %618 = vrot.lane.b32.xlu1 %v1524_v46, %s1877_s20  ;;  %608 = vrot.lane.b32.xlu0 %v1524_v46, %s1875_s23  ;;  %s2108_s23 = sld [smem:[#allocation9 + $0x11]]  ;;  %s2112_s20 = sld [smem:[#allocation9 + $0x4]] }
  0xad   : > { %3460 = sst [smem:[#allocation98_spill]] %s2278_s10  ;;  %s3532_s16 = sld [smem:[#allocation71_spill]] }
  0xae   : > { %3462 = sst [smem:[#allocation99_spill]] %s2283_s1  ;;  %s3530_s1 = sld [smem:[#allocation66_spill]] }
  0xaf   : > { %3465 = sst [smem:[#allocation101_spill]] %s2293_s5  ;;  %s2408_s5 = sld [smem:[#allocation9 + $0x1c]] }
  0xb0   : > { %638 = vrot.lane.b32.xlu1 %v1524_v46, %s1876_s28  ;;  %628 = vrot.lane.b32.xlu0 %v1524_v46, %s1874_s21  ;;  %s2106_s21 = sld [smem:[#allocation9 + $0x17]]  ;;  %s2110_s28 = sld [smem:[#allocation9 + $0x18]] }
  0xb1   : > { %3474 = sst [smem:[#allocation104_spill]] %s2307_s12  ;;  %s3533_s19 = sld [smem:[#allocation73_spill]] }
  0xb2   : > { %3373 = sst [smem:[#allocation35_spill]] %s2108_s23  ;;  %v791_v59 = vstv %s2108_s23  ;;  %v709_v62 = vstv %s2112_s20  ;;  %s3428_s23 = sld [smem:[#allocation49_spill]] }
  0xb3   : > { %3375 = sst [smem:[#allocation37_spill]] %s2112_s20  ;;  %s2253_s20 = sld [smem:[#allocation9 + $0x5d]] }
  0xb4   : > { %658 = vrot.lane.b32.xlu1 %v1524_v46, %s1878_s22  ;;  %648 = vrot.lane.b32.xlu0 %v1524_v46, %s1879_s26  ;;  %s2114_s22 = sld [smem:[#allocation9 + $0x1d]]  ;;  %s2116_s26 = sld [smem:[#allocation9 + $0xb]] }
  0xb5   : > { %3476 = sst [smem:[#allocation105_spill]] %s2309_s18  ;;  %s3534_s24 = sld [smem:[#allocation68_spill]] }
  0xb6   : > { %3372 = sst [smem:[#allocation34_spill]] %s2106_s21  ;;  %v829_v58 = vstv %s2106_s21  ;;  %v835_v61 = vstv %s2110_s28  ;;  %s3427_s21 = sld [smem:[#allocation48_spill]] }
  0xb7   : > { %3374 = sst [smem:[#allocation36_spill]] %s2110_s28  ;;  %s3435_s28 = sld [smem:[#allocation54_spill]] }
  0xb8   : > { %678 = vrot.lane.b32.xlu1 %v1524_v46, %s1880_s27  ;;  %668 = vrot.lane.b32.xlu0 %v1524_v46, %s1881_s6  ;;  %s2118_s27 = sld [smem:[#allocation9 + $0x24]]  ;;  %s2120_s6 = sld [smem:[#allocation9 + $0x1e]]  ;;  %v967_v11 = vstv %s3428_s23 }
  0xb9   : > { %3445 = sst [smem:[#allocation92_spill]] %s2253_s20  ;;  %s2269_s20 = sld [smem:[#allocation9 + $0x44]] }
  0xba   : > { %3376 = sst [smem:[#allocation38_spill]] %s2114_s22  ;;  %v867_v60 = vstv %s2114_s22  ;;  %v753_v63 = vstv %s2116_s26  ;;  %s2237_s22 = sld [smem:[#allocation9 + $0x57]] }
  0xbb   : > { %3377 = sst [smem:[#allocation39_spill]] %s2116_s26  ;;  %s2249_s26 = sld [smem:[#allocation9 + $0x3d]] }
  0xbc   : > { %v961_v10 = vstv %s3427_s21  ;;  %s3448_s21 = sld [smem:[#allocation63_spill]]  ;;  %s2291_s23 = sld [smem:[#allocation9 + $0x52]] }
  0xbd   : > { %v3303_v16 = vstv %s3435_s28  ;;  %3481 = sst [smem:[#allocation106_spill]] %s2315_s3  ;;  %s2365_s28 = sld [smem:[#allocation9 + $0x61]] }
  0xbe   : > { %3378 = sst [smem:[#allocation40_spill]] %s2118_s27  ;;  %v911_v0 = vstv %s2118_s27  ;;  %v873_v1 = vstv %s2120_s6  ;;  %s2241_s27 = sld [smem:[#allocation9 + $0x36]] }
  0xbf   : > { %3379 = sst [smem:[#allocation41_spill]] %s2120_s6  ;;  %s3437_s6 = sld [smem:[#allocation55_spill]] }
  0xc0   : > { %3433 = sst [smem:[#allocation88_spill]] %s2237_s22  ;;  %s2255_s22 = sld [smem:[#allocation9 + $0x5e]] }
  0xc1   : > { %3442 = sst [smem:[#allocation91_spill]] %s2249_s26  ;;  %s2263_s26 = sld [smem:[#allocation9 + $0x58]] }
  0xc2   : > { %3455 = sst [smem:[#allocation96_spill]] %s2269_s20  ;;  %v3335_v25 = vstv %s3448_s21  ;;  %s2299_s21 = sld [smem:[#allocation9 + $0x59]] }
  0xc3   : > { %3464 = sst [smem:[#allocation100_spill]] %s2291_s23  ;;  %s3531_s3 = sld [smem:[#allocation69_spill]] }
  0xc4   : > { %3436 = sst [smem:[#allocation89_spill]] %s2241_s27  ;;  %s3446_s27 = sld [smem:[#allocation62_spill]] }
  0xc5   : > { %v3310_v17 = vstv %s3437_s6  ;;  %3486 = sst [smem:[#allocation25_spill]] %s2331_s11  ;;  %s2367_s6 = sld [smem:[#allocation9 + $0x7]] }
  0xc6   : > { %3447 = sst [smem:[#allocation93_spill]] %s2255_s22  ;;  %s3518_s11 = sld [smem:[#allocation51_spill]] }
  0xc7   : > { %3452 = sst [smem:[#allocation95_spill]] %s2263_s26  ;;  %s2341_s26 = sld [smem:[#allocation9 + $0x5a]] }
  0xc8   : > { %3468 = sst [smem:[#allocation102_spill]] %s2299_s21  ;;  %s2395_s21 = sld [smem:[#allocation9 + $0xe]] }
  0xc9   : > { %3492 = sst [smem:[#allocation27_spill]] %s2365_s28  ;;  %s3536_s30 = sld [smem:[#allocation70_spill]] }
  0xca   : > { %v3327_v24 = vstv %s3446_s27  ;;  %s2301_s27 = sld [smem:[#allocation9 + $0x45]]  ;;  %3504 = sst [smem:[#allocation37_spill]] %s2408_s5 }
  0xcb   : > { %3494 = sst [smem:[#allocation28_spill]] %s2367_s6  ;;  %s3540_s18 = sld [smem:[#allocation72_spill]] }
  0xcc   : > { %s3543_s10 = sld [smem:[#allocation75_spill]]  ;;  %s3550_s12 = sld [smem:[#allocation77_spill]] }
  0xcd   : > { %3489 = sst [smem:[#allocation26_spill]] %s2341_s26  ;;  %s3551_s13 = sld [smem:[#allocation79_spill]] }
  0xce   : > { %3500 = sst [smem:[#allocation29_spill]] %s2395_s21  ;;  %s3558_s4 = sld [smem:[#allocation78_spill]] }
  0xcf   : > { %s3552_s2 = sld [smem:[#allocation53_spill]]  ;;  %s3561_s21 = sld [smem:[#allocation80_spill]] }
  0xd0   : > { %3469 = sst [smem:[#allocation103_spill]] %s2301_s27  ;;  %s2397_s27 = sld [smem:[#allocation9 + $0x15]] }
  0xd1   : > { %s3564_s23 = sld [smem:[#allocation82_spill]]  ;;  %s3566_s28 = sld [smem:[#allocation85_spill]] }
  0xd2   : > { %s3568_s20 = sld [smem:[#allocation87_spill]]  ;;  %s3569_s22 = sld [smem:[#allocation84_spill]] }
  0xd3   : > { %s3571_s26 = sld [smem:[#allocation91_spill]]  ;;  %s3578_s14 = sld [smem:[#allocation90_spill]] }
  0xd4   : > { %s3579_s15 = sld [smem:[#allocation94_spill]]  ;;  %s3581_s6 = sld [smem:[#allocation88_spill]] }
  0xd5   : > { %s3583_s5 = sld [smem:[#allocation99_spill]]  ;;  %s3586_s9 = sld [smem:[#allocation96_spill]] }
  0xd6   : > { %3502 = sst [smem:[#allocation31_spill]] %s2397_s27  ;;  %s3574_s27 = sld [smem:[#allocation86_spill]] }
  0xd7   : > { %s3588_s25 = sld [smem:[#allocation93_spill]]  ;;  %s3595_s8 = sld [smem:[#allocation95_spill]] }
  0xd8   : > { %s2896_s0 = sld [smem:[#allocation9 + $0x2a]] }
  0xee   : > { %v388_v54 = vpop.permute.xlu1 %387  ;;  %v367_v55 = vpop.permute.xlu0 %366 }
  0xef   : > { %390 = vst.msk [vmem:[#allocation3 + $0x5] sm:$0x1] %vm369_vm4, %v388_v54  ;;  %370 = vst.msk [vmem:[#allocation3 + $0x3] sm:$0x1] %vm369_vm4, %v367_v55 }
  0xf2   : > { %v398_v8 = vpop.permute.xlu1 %397  ;;  %v378_v9 = vpop.permute.xlu0 %377 }
  0xf3   : > { %400 = vst.msk [vmem:[#allocation3 + $0x6] sm:$0x1] %vm369_vm4, %v398_v8  ;;  %380 = vst.msk [vmem:[#allocation3 + $0x4] sm:$0x1] %vm369_vm4, %v378_v9 }
  0xf6   : > { %v418_v26 = vpop.permute.xlu1 %417  ;;  %v408_v27 = vpop.permute.xlu0 %407 }
  0xf7   : > { %420 = vst.msk [vmem:[#allocation3 + $0x8] sm:$0x1] %vm369_vm4, %v418_v26  ;;  %410 = vst.msk [vmem:[#allocation3 + $0x7] sm:$0x1] %vm369_vm4, %v408_v27 }
  0xfa   : > { %v438_v44 = vpop.permute.xlu1 %437  ;;  %v428_v45 = vpop.permute.xlu0 %427 }
  0xfb   : > { %440 = vst.msk [vmem:[#allocation3 + $0xa] sm:$0x1] %vm369_vm4, %v438_v44  ;;  %430 = vst.msk [vmem:[#allocation3 + $0x9] sm:$0x1] %vm369_vm4, %v428_v45 }
  0xfe   : > { %v2333_v45 = vld [vmem:[#allocation3] sm:$0xff]  ;;  %v458_v54 = vpop.permute.xlu1 %457  ;;  %v448_v46 = vpop.permute.xlu0 %447 }
  0xff   : > { %v2335_v27 = vld [vmem:[#allocation3 + $0x1] sm:$0xff]  ;;  %460 = vst.msk [vmem:[#allocation3 + $0xc] sm:$0x1] %vm369_vm4, %v458_v54  ;;  %450 = vst.msk [vmem:[#allocation3 + $0xb] sm:$0x1] %vm369_vm4, %v448_v46  ;;  %v692_v44 = vmul.f32 %v691_v47, %v2333_v45  ;;  %v698_v43 = vmul.f32 %v697_v49, %v2333_v45  ;;  %v704_v55 = vmul.f32 %v703_v52, %v2333_v45 }
 0x100   : > { %v736_v9 = vmul.f32 %v735_v48, %v2335_v27  ;;  %v742_v8 = vmul.f32 %v741_v51, %v2335_v27  ;;  %v748_v46 = vmul.f32 %v747_v53, %v2335_v27  ;;  %v710_v32 = vmul.f32 %v709_v62, %v2333_v45 }
 0x101   : > { %v754_v42 = vmul.f32 %v753_v63, %v2335_v27 }
 0x102   : > { %v2373_v39 = vld [vmem:[#allocation3 + $0x2] sm:$0xff]  ;;  %v478_v34 = vpop.permute.xlu1 %477  ;;  %v468_v54 = vpop.permute.xlu0 %467  ;;  %v738_v41 = vadd.f32 %v736_v9, %v692_v44  ;;  %v744_v40 = vadd.f32 %v742_v8, %v698_v43  ;;  %v716_v44 = vmul.f32 %v3302_v15, %v2333_v45  ;;  %v760_v43 = vmul.f32 %v3303_v16, %v2335_v27 }
 0x103   : > { %v2375_v37 = vld [vmem:[#allocation3 + $0x3] sm:$0xff]  ;;  %480 = vst.msk [vmem:[#allocation3 + $0xe] sm:$0x1] %vm369_vm4, %v478_v34  ;;  %470 = vst.msk [vmem:[#allocation3 + $0xd] sm:$0x1] %vm369_vm4, %v468_v54  ;;  %v780_v36 = vmul.f32 %v779_v50, %v2373_v39  ;;  %v786_v9 = vmul.f32 %v785_v57, %v2373_v39  ;;  %v750_v34 = vadd.f32 %v748_v46, %v704_v55 }
 0x104   : > { %v792_v54 = vmul.f32 %v791_v59, %v2373_v39  ;;  %v798_v26 = vmul.f32 %v3304_v6, %v2373_v39  ;;  %v824_v15 = vmul.f32 %v823_v56, %v2375_v37  ;;  %v756_v16 = vadd.f32 %v754_v42, %v710_v32 }
 0x105   : > { %v782_v8 = vadd.f32 %v780_v36, %v738_v41  ;;  %v788_v38 = vadd.f32 %v786_v9, %v744_v40  ;;  %v804_v6 = vmul.f32 %v3310_v17, %v2373_v39  ;;  %v830_v9 = vmul.f32 %v829_v58, %v2375_v37 }
 0x106   : > { %v2414_v46 = vld [vmem:[#allocation3 + $0x4] sm:$0xff]  ;;  %v498_v35 = vpop.permute.xlu1 %497  ;;  %v488_v33 = vpop.permute.xlu0 %487  ;;  %v794_v28 = vadd.f32 %v792_v54, %v750_v34  ;;  %v836_v32 = vmul.f32 %v835_v61, %v2375_v37  ;;  %v800_v42 = vadd.f32 %v798_v26, %v756_v16  ;;  %v762_v34 = vadd.f32 %v760_v43, %v716_v44 }
 0x107   : > { %500 = vst.msk [vmem:[#allocation3 + $0x10] sm:$0x1] %vm369_vm4, %v498_v35  ;;  %490 = vst.msk [vmem:[#allocation3 + $0xf] sm:$0x1] %vm369_vm4, %v488_v33  ;;  %v826_v40 = vadd.f32 %v824_v15, %v782_v8  ;;  %v868_v41 = vmul.f32 %v867_v60, %v2414_v46  ;;  %v2433_v33 = vld [vmem:[#allocation3 + $0x5] sm:$0xff]  ;;  %v832_v15 = vadd.f32 %v830_v9, %v788_v38 }
 0x108   : > { %v874_v8 = vmul.f32 %v873_v1, %v2414_v46  ;;  %v838_v17 = vadd.f32 %v836_v32, %v794_v28  ;;  %v880_v36 = vmul.f32 %v879_v3, %v2414_v46  ;;  %v842_v44 = vmul.f32 %v3330_v7, %v2375_v37 }
 0x109   : > { %v806_v43 = vadd.f32 %v804_v6, %v762_v34  ;;  %v722_v35 = vmul.f32 %v3318_v22, %v2333_v45  ;;  %v766_v38 = vmul.f32 %v3317_v23, %v2335_v27  ;;  %v870_v28 = vadd.f32 %v868_v41, %v826_v40 }
 0x10a   : > { %v518_v16 = vpop.permute.xlu1 %517  ;;  %v508_v26 = vpop.permute.xlu0 %507  ;;  %v848_v9 = vmul.f32 %v3323_v18, %v2375_v37  ;;  %v912_v6 = vmul.f32 %v911_v0, %v2433_v33  ;;  %v844_v34 = vadd.f32 %v842_v44, %v800_v42  ;;  %v886_v23 = vmul.f32 %v3329_v12, %v2414_v46 }
 0x10b   : > { %520 = vst.msk [vmem:[#allocation3 + $0x12] sm:$0x1] %vm369_vm4, %v518_v16  ;;  %510 = vst.msk [vmem:[#allocation3 + $0x11] sm:$0x1] %vm369_vm4, %v508_v26  ;;  %v2464_v16 = vld [vmem:[#allocation3 + $0x6] sm:$0xff]  ;;  %v876_v40 = vadd.f32 %v874_v8, %v832_v15  ;;  %v882_v41 = vadd.f32 %v880_v36, %v838_v17  ;;  %v892_v54 = vmul.f32 %v3326_v19, %v2414_v46 }
 0x10c   : > { %v850_v26 = vadd.f32 %v848_v9, %v806_v43  ;;  %v918_v18 = vmul.f32 %v917_v2, %v2433_v33  ;;  %v924_v17 = vmul.f32 %v923_v5, %v2433_v33  ;;  %v930_v36 = vmul.f32 %v3328_v13, %v2433_v33 }
 0x10d   : > { %v768_v15 = vadd.f32 %v766_v38, %v722_v35  ;;  %v914_v8 = vadd.f32 %v912_v6, %v870_v28  ;;  %v810_v19 = vmul.f32 %v3327_v24, %v2373_v39  ;;  %v956_v35 = vmul.f32 %v955_v4, %v2464_v16 }
 0x10e   : > { %v2469_v32 = vld [vmem:[#allocation3 + $0x8] sm:$0xff]  ;;  %v539_v44 = vpop.permute.xlu1 %538  ;;  %v528_v22 = vpop.permute.xlu0 %527  ;;  %v968_v38 = vmul.f32 %v967_v11, %v2464_v16  ;;  %v920_v28 = vadd.f32 %v918_v18, %v876_v40  ;;  %v926_v6 = vadd.f32 %v924_v17, %v882_v41  ;;  %v854_v7 = vmul.f32 %v3335_v25, %v2375_v37 }
 0x10f   : > { %v2471_v42 = vld [vmem:[#allocation3 + $0x9] sm:$0xff]  ;;  %541 = vst.msk [vmem:[#allocation3 + $0x1c] sm:$0x1] %vm369_vm4, %v539_v44  ;;  %531 = vst.msk [vmem:[#allocation3 + $0x1b] sm:$0x1] %vm369_vm4, %v528_v22  ;;  %v693_v43 = vmul.f32 %v691_v47, %v2469_v32  ;;  %v962_v22 = vmul.f32 %v961_v10, %v2464_v16  ;;  %v888_v47 = vadd.f32 %v886_v23, %v844_v34 }
 0x110   : > { %v737_v9 = vmul.f32 %v735_v48, %v2471_v42  ;;  %v894_v48 = vadd.f32 %v892_v54, %v850_v26  ;;  %v812_v44 = vadd.f32 %v810_v19, %v768_v15  ;;  %v898_v23 = vmul.f32 %v3334_v29, %v2414_v46 }
 0x111   : > { %v699_v18 = vmul.f32 %v697_v49, %v2469_v32  ;;  %v743_v19 = vmul.f32 %v741_v51, %v2471_v42  ;;  %v974_v54 = vmul.f32 %v973_v14, %v2464_v16  ;;  %v936_v34 = vmul.f32 %v935_v20, %v2433_v33 }
 0x112   : > { %v2502_v55 = vld [vmem:[#allocation3 + $0xa] sm:$0xff]  ;;  %v559_v13 = vpop.permute.xlu1 %558  ;;  %v549_v12 = vpop.permute.xlu0 %548  ;;  %v739_v40 = vadd.f32 %v737_v9, %v693_v43  ;;  %v932_v49 = vadd.f32 %v930_v36, %v888_v47  ;;  %v856_v26 = vadd.f32 %v854_v7, %v812_v44  ;;  %v705_v51 = vmul.f32 %v703_v52, %v2469_v32 }
 0x113   : > { %v2504_v24 = vld [vmem:[#allocation3 + $0xb] sm:$0xff]  ;;  %561 = vst.msk [vmem:[#allocation3 + $0x1e] sm:$0x1] %vm369_vm4, %v559_v13  ;;  %551 = vst.msk [vmem:[#allocation3 + $0x1d] sm:$0x1] %vm369_vm4, %v549_v12  ;;  %v781_v41 = vmul.f32 %v779_v50, %v2502_v55  ;;  %v749_v13 = vmul.f32 %v747_v53, %v2471_v42  ;;  %v745_v43 = vadd.f32 %v743_v19, %v699_v18 }
 0x114   : > { %v2535_v12 = vld [vmem:[#allocation3 + $0xc] sm:$0xff]  ;;  %v825_v15 = vmul.f32 %v823_v56, %v2504_v24  ;;  %v787_v50 = vmul.f32 %v785_v57, %v2502_v55  ;;  %v958_v52 = vadd.f32 %v956_v35, %v914_v8  ;;  %v938_v9 = vadd.f32 %v936_v34, %v894_v48 }
 0x115   : > { %v783_v17 = vadd.f32 %v781_v41, %v739_v40  ;;  %v980_v53 = vmul.f32 %v3336_v21, %v2464_v16  ;;  %v900_v47 = vadd.f32 %v898_v23, %v856_v26  ;;  %v2546_v44 = vld [vmem:[#allocation3 + $0xd] sm:$0xff]  ;;  %v942_v57 = vmul.f32 %v3332_v30, %v2433_v33 }
 0x116   : > { %v579_v7 = vpop.permute.xlu1 %578  ;;  %v569_v36 = vpop.permute.xlu0 %568  ;;  %v789_v18 = vadd.f32 %v787_v50, %v745_v43  ;;  %v793_v8 = vmul.f32 %v791_v59, %v2502_v55  ;;  %v964_v35 = vadd.f32 %v962_v22, %v920_v28  ;;  %v970_v48 = vadd.f32 %v968_v38, %v926_v6  ;;  %v2559_v19 = vld [vmem:[#allocation3 + $0xe] sm:$0xff] }
 0x117   : > { %581 = vst.msk [vmem:[#allocation3 + $0x20] sm:$0x1] %vm369_vm4, %v579_v7  ;;  %571 = vst.msk [vmem:[#allocation3 + $0x1f] sm:$0x1] %vm369_vm4, %v569_v36  ;;  %v827_v56 = vadd.f32 %v825_v15, %v783_v17  ;;  %v869_v23 = vmul.f32 %v867_v60, %v2535_v12  ;;  %v831_v34 = vmul.f32 %v829_v58, %v2504_v24 }
 0x118   : > { %v976_v40 = vadd.f32 %v974_v54, %v932_v49  ;;  %v944_v41 = vadd.f32 %v942_v57, %v900_v47  ;;  %v986_v59 = vmul.f32 %v3331_v31, %v2464_v16  ;;  %v751_v22 = vadd.f32 %v749_v13, %v705_v51 }
 0x119   : > { %v2567_v60 = vadd.f32 %v980_v53, %v938_v9  ;;  %v871_v6 = vadd.f32 %v869_v23, %v827_v56  ;;  %v913_v58 = vmul.f32 %v911_v0, %v2546_v44  ;;  %v833_v54 = vadd.f32 %v831_v34, %v789_v18 }
 0x11a   : > { %v599_v38 = vpop.permute.xlu1 %598  ;;  %v589_v28 = vpop.permute.xlu0 %588  ;;  %v2577_v49 = vmul.f32 %v955_v4, %v2559_v19  ;;  %v875_v26 = vmul.f32 %v873_v1, %v2535_v12  ;;  %v2585_v51 = vmul.f32 %v917_v2, %v2546_v44  ;;  %v795_v13 = vadd.f32 %v793_v8, %v751_v22 }
 0x11b   : > { %601 = vst.msk [vmem:[#allocation3 + $0x22] sm:$0x1] %vm369_vm4, %v599_v38  ;;  %591 = vst.msk [vmem:[#allocation3 + $0x21] sm:$0x1] %vm369_vm4, %v589_v28  ;;  %v2590_v0 = vmul.f32 %v961_v10, %v2559_v19  ;;  %v837_v17 = vmul.f32 %v835_v61, %v2504_v24  ;;  %v711_v4 = vmul.f32 %v709_v62, %v2469_v32  ;;  %v3538_v53 = vstv %s3530_s1 }
 0x11c   : > { %v755_v1 = vmul.f32 %v753_v63, %v2471_v42  ;;  %v2601_v2 = vadd.f32 %v986_v59, %v944_v41  ;;  %v2606_v15 = vmul.f32 %v879_v3, %v2535_v12  ;;  %v2611_v10 = vmul.f32 %v923_v5, %v2546_v44 }
 0x11d   : > { %v2616_v61 = vmul.f32 %v967_v11, %v2559_v19  ;;  %v915_v3 = vadd.f32 %v913_v58, %v871_v6  ;;  %v2622_v7 = vadd.f32 %v875_v26, %v833_v54  ;;  %v3535_v5 = vstv %s3497_s7  ;;  %s3546_s7 = sld [smem:[#allocation74_spill]] }
 0x11e   : > { %v619_v62 = vpop.permute.xlu1 %618  ;;  %v609_v63 = vpop.permute.xlu0 %608  ;;  %v2618_v43 = vld [vmem:[#allocation3 + $0x18] sm:$0xff]  ;;  %v2627_v36 = vmul.f32 %v3535_v5, %v2502_v55  ;;  %v3537_v11 = vstv %s3509_s29  ;;  %v3539_v56 = vstv %s3531_s3  ;;  %v2642_v18 = vadd.f32 %v837_v17, %v795_v13  ;;  %s3555_s29 = sld [smem:[#allocation81_spill]] }
 0x11f   : > { %v2620_v50 = vld [vmem:[#allocation3 + $0x19] sm:$0xff]  ;;  %v2632_v9 = vmul.f32 %v3537_v11, %v2504_v24  ;;  %621 = vst.msk [vmem:[#allocation3 + $0x24] sm:$0x1] %vm369_vm4, %v619_v62  ;;  %611 = vst.msk [vmem:[#allocation3 + $0x23] sm:$0x1] %vm369_vm4, %v609_v63  ;;  %v1000_v47 = vmul.f32 %v3538_v53, %v2618_v43  ;;  %v1006_v57 = vmul.f32 %v3539_v56, %v2618_v43  ;;  %v3541_v8 = vstv %s3514_s17  ;;  %s3548_s17 = sld [smem:[#allocation89_spill]] }
 0x120   : > { %v2647_v23 = vmul.f32 %v3541_v8, %v2535_v12  ;;  %v3542_v34 = vstv %s3532_s16  ;;  %v3544_v59 = vstv %s3533_s19  ;;  %v2655_v38 = vadd.f32 %v755_v1, %v711_v4 }
 0x121   : > { %v1012_v41 = vmul.f32 %v3542_v34, %v2618_v43  ;;  %v1018_v22 = vmul.f32 %v3544_v59, %v2618_v43  ;;  %v3545_v28 = vstv %s3518_s11  ;;  %v1002_v58 = vadd.f32 %v1000_v47, %v958_v52  ;;  %s3553_s11 = sld [smem:[#allocation76_spill]] }
 0x122   : > { %v2660_v6 = vmul.f32 %v3545_v28, %v2546_v44  ;;  %v3547_v54 = vstv %s3534_s24  ;;  %v1008_v13 = vadd.f32 %v1006_v57, %v964_v35  ;;  %v3549_v17 = vstv %s3536_s30  ;;  %v639_v63 = vpop.permute.xlu1 %638  ;;  %v629_v5 = vpop.permute.xlu0 %628  ;;  %v2668_v4 = vld [vmem:[#allocation3 + $0x1a] sm:$0xff] }
 0x123   : > { %v1044_v26 = vmul.f32 %v3547_v54, %v2620_v50  ;;  %v1050_v62 = vmul.f32 %v3549_v17, %v2620_v50  ;;  %v2670_v1 = vld [vmem:[#allocation3 + $0x1b] sm:$0xff]  ;;  %v1014_v11 = vadd.f32 %v1012_v41, %v970_v48  ;;  %v3554_v52 = vstv %s3540_s18  ;;  %641 = vst.msk [vmem:[#allocation3 + $0x26] sm:$0x1] %vm369_vm4, %v639_v63  ;;  %631 = vst.msk [vmem:[#allocation3 + $0x25] sm:$0x1] %vm369_vm4, %v629_v5 }
 0x124   : > { %v1056_v53 = vmul.f32 %v3554_v52, %v2620_v50  ;;  %v1020_v47 = vadd.f32 %v1018_v22, %v976_v40  ;;  %v3556_v35 = vstv %s3543_s10  ;;  %v3557_v8 = vstv %s3546_s7  ;;  %s3333_s10 = smov 127  }
 0x125   : > { %v1062_v56 = vmul.f32 %v3556_v35, %v2620_v50  ;;  %v1046_v57 = vadd.f32 %v1044_v26, %v1002_v58  ;;  %v1088_v34 = vmul.f32 %v3557_v8, %v2668_v4  ;;  %v1052_v59 = vadd.f32 %v1050_v62, %v1008_v13 }
 0x126   : > { %v3559_v48 = vstv %s3548_s17  ;;  %v3560_v28 = vstv %s3550_s12  ;;  %v1058_v22 = vadd.f32 %v1056_v53, %v1014_v11  ;;  %v3562_v54 = vstv %s3551_s13  ;;  %v659_v8 = vpop.permute.xlu1 %658  ;;  %v649_v11 = vpop.permute.xlu0 %648  ;;  %v2703_v53 = vld [vmem:[#allocation3 + $0x1c] sm:$0xff]  ;;  %s3585_s17 = sld [smem:[#allocation92_spill]] }
 0x127   : > { %v1024_v41 = vmul.f32 %v3559_v48, %v2618_v43  ;;  %v1094_v40 = vmul.f32 %v3560_v28, %v2668_v4  ;;  %v1100_v17 = vmul.f32 %v3562_v54, %v2668_v4  ;;  %v3563_v63 = vstv %s3552_s2  ;;  %v2705_v48 = vld [vmem:[#allocation3 + $0x1d] sm:$0xff]  ;;  %661 = vst.msk [vmem:[#allocation3 + $0x28] sm:$0x1] %vm369_vm4, %v659_v8  ;;  %651 = vst.msk [vmem:[#allocation3 + $0x27] sm:$0x1] %vm369_vm4, %v649_v11  ;;  %s3576_s2 = sld [smem:[#allocation83_spill]] }
 0x128   : > { %v2695_v5 = vmul.f32 %v3563_v63, %v2469_v32  ;;  %v1090_v58 = vadd.f32 %v1088_v34, %v1046_v57  ;;  %v3565_v26 = vstv %s3553_s11  ;;  %v1064_v62 = vadd.f32 %v1062_v56, %v1020_v47 }
 0x129   : > { %v1132_v13 = vmul.f32 %v3565_v26, %v2670_v1  ;;  %v3567_v52 = vstv %s3555_s29  ;;  %v1096_v28 = vadd.f32 %v1094_v40, %v1052_v59  ;;  %v3570_v54 = vstv %s3558_s4  ;;  %s3599_s29 = sld [smem:[#allocation103_spill]] }
 0x12a   : > { %v1106_v35 = vmul.f32 %v3567_v52, %v2668_v4  ;;  %v1138_v57 = vmul.f32 %v3570_v54, %v2670_v1  ;;  %v1102_v34 = vadd.f32 %v1100_v17, %v1058_v22  ;;  %v3572_v63 = vstv %s3561_s21 }
 0x12b   : > { %v1144_v47 = vmul.f32 %v3572_v63, %v2670_v1  ;;  %v1134_v56 = vadd.f32 %v1132_v13, %v1090_v58  ;;  %v3573_v26 = vstv %s3564_s23  ;;  %v3575_v31 = vstv %s3566_s28 }
 0x12c   : > { %v1176_v52 = vmul.f32 %v3573_v26, %v2703_v53  ;;  %v1182_v59 = vmul.f32 %v3575_v31, %v2703_v53  ;;  %v1026_v40 = vadd.f32 %v1024_v41, %v2567_v60  ;;  %v1140_v54 = vadd.f32 %v1138_v57, %v1096_v28  ;;  %v679_v60 = vpop.permute.xlu1 %678  ;;  %v669_v41 = vpop.permute.xlu0 %668  ;;  %v2732_v28 = vld [vmem:[#allocation3 + $0x1e] sm:$0xff] }
 0x12d   : > { %v1146_v22 = vadd.f32 %v1144_v47, %v1102_v34  ;;  %v3577_v17 = vstv %s3568_s20  ;;  %v959_v8 = vadd.f32 %v2577_v49, %v915_v3  ;;  %v3580_v13 = vstv %s3569_s22  ;;  %681 = vst.msk [vmem:[#allocation3 + $0x2a] sm:$0x1] %vm369_vm4, %v679_v60  ;;  %671 = vst.msk [vmem:[#allocation3 + $0x29] sm:$0x1] %vm369_vm4, %v669_v41 }
 0x12e   : > { %v1188_v63 = vmul.f32 %v3577_v17, %v2703_v53  ;;  %v1178_v58 = vadd.f32 %v1176_v52, %v1134_v56  ;;  %v1220_v11 = vmul.f32 %v3580_v13, %v2705_v48  ;;  %v1108_v26 = vadd.f32 %v1106_v35, %v1064_v62 }
 0x12f   : > { %v3582_v31 = vstv %s3571_s26  ;;  %v1184_v57 = vadd.f32 %v1182_v59, %v1140_v54  ;;  %v3584_v34 = vstv %s3574_s27  ;;  %v3587_v47 = vstv %s3576_s2  ;;  %s3590_s26 = sld [smem:[#allocation101_spill]]  ;;  %s3594_s2 = sld [smem:[#allocation97_spill]] }
 0x130   : > { %v1068_v30 = vmul.f32 %v3582_v31, %v2620_v50  ;;  %v1226_v49 = vmul.f32 %v3584_v34, %v2705_v48  ;;  %v1190_v3 = vadd.f32 %v1188_v63, %v1146_v22  ;;  %v1150_v56 = vmul.f32 %v3587_v47, %v2670_v1 }
 0x131   : > { %v1222_v62 = vadd.f32 %v1220_v11, %v1178_v58  ;;  %v3589_v35 = vstv %s3578_s14  ;;  %v3591_v59 = vstv %s3579_s15  ;;  %v3592_v13 = vstv %s3581_s6  ;;  %s3597_s15 = sld [smem:[#allocation100_spill]] }
 0x132   : > { %v1264_v52 = vmul.f32 %v3589_v35, %v2732_v28  ;;  %v1194_v54 = vmul.f32 %v3591_v59, %v2703_v53  ;;  %v1070_v17 = vadd.f32 %v1068_v30, %v1026_v40  ;;  %v1232_v22 = vmul.f32 %v3592_v13, %v2705_v48  ;;  %v2765_v59 = vld [vmem:[#allocation3 + $0x20] sm:$0xff] }
 0x133   : > { %v1152_v63 = vadd.f32 %v1150_v56, %v1108_v26  ;;  %v3593_v31 = vstv %s3583_s5  ;;  %v921_v60 = vadd.f32 %v2585_v51, %v2622_v7  ;;  %v1228_v11 = vadd.f32 %v1226_v49, %v1184_v57  ;;  %v2767_v13 = vld [vmem:[#allocation3 + $0x21] sm:$0xff]  ;;  %s3602_s5 = sld [smem:[#allocation98_spill]] }
 0x134   : > { %v1030_v34 = vmul.f32 %v3593_v31, %v2618_v43  ;;  %v1266_v58 = vadd.f32 %v1264_v52, %v1222_v62  ;;  %v3596_v41 = vstv %s3585_s17  ;;  %v3598_v30 = vstv %s3586_s9  ;;  %s3604_s9 = sld [smem:[#allocation54_spill]]  ;;  %v2797_v29 = vld [vmem:[#allocation3 + $0x22] sm:$0xff] }
 0x135   : > { %v1270_v47 = vmul.f32 %v3596_v41, %v2732_v28  ;;  %v1112_v40 = vmul.f32 %v3598_v30, %v2668_v4  ;;  %v1234_v26 = vadd.f32 %v1232_v22, %v1190_v3  ;;  %v3600_v56 = vstv %s3588_s25 }
 0x136   : > { %v1276_v35 = vmul.f32 %v3600_v56, %v2732_v28  ;;  %v3601_v51 = vstv %s3590_s26  ;;  %v883_v57 = vadd.f32 %v2606_v15, %v2642_v18  ;;  %1300 = vrot.lane.b32.xlu0 %v1266_v58, %s3333_s10  ;;  %v1196_v49 = vadd.f32 %v1194_v54, %v1152_v63  ;;  %s3610_s10 = sld [smem:[#allocation105_spill]]  ;;  %s3615_s26 = sld [smem:[#allocation104_spill]] }
 0x137   : > { %v1074_v7 = vmul.f32 %v3601_v51, %v2620_v50  ;;  %v1114_v3 = vadd.f32 %v1112_v40, %v1070_v17  ;;  %v3603_v62 = vstv %s3594_s2  ;;  %v3605_v22 = vstv %s3530_s1  ;;  %s3612_s1 = sld [smem:[#allocation25_spill]] }
 0x138   : > { %v1156_v52 = vmul.f32 %v3603_v62, %v2670_v1  ;;  %v1001_v31 = vmul.f32 %v3605_v22, %v2765_v59  ;;  %v3606_v41 = vstv %s3595_s8  ;;  %v3607_v56 = vstv %s3597_s15 }
 0x139   : > { %v1238_v30 = vmul.f32 %v3606_v41, %v2705_v48  ;;  %v1200_v51 = vmul.f32 %v3607_v56, %v2703_v53  ;;  %v1032_v15 = vadd.f32 %v1030_v34, %v2601_v2  ;;  %v3608_v18 = vstv %s3599_s29  ;;  %v2799_v56 = vld [vmem:[#allocation3 + $0x23] sm:$0xff]  ;;  %s3614_s29 = sld [smem:[#allocation102_spill]] }
 0x13a   : > { %v1118_v58 = vmul.f32 %v3608_v18, %v2668_v4  ;;  %v1272_v54 = vadd.f32 %v1270_v47, %v1228_v11  ;;  %v1158_v17 = vadd.f32 %v1156_v52, %v1114_v3  ;;  %v1003_v63 = vadd.f32 %v1001_v31, %v959_v8 }
 0x13b   : > { %v3609_v40 = vstv %s3534_s24  ;;  %v3611_v22 = vstv %s3602_s5  ;;  %v1076_v2 = vadd.f32 %v1074_v7, %v1032_v15  ;;  %v801_v34 = vadd.f32 %v2627_v36, %v2655_v38  ;;  %s1883_s24 = smov 126   ;;  %v2812_v15 = vld [vmem:[#allocation3 + $0x24] sm:$0xff] }
 0x13c   : > { %v1045_v62 = vmul.f32 %v3609_v40, %v2767_v13  ;;  %v1282_v41 = vmul.f32 %v3611_v22, %v2732_v28  ;;  %v3613_v11 = vstv %s3604_s9  ;;  %1310 = vrot.lane.b32.xlu0 %v1272_v54, %s1883_s24  ;;  %v1278_v47 = vadd.f32 %v1276_v35, %v1234_v26  ;;  %s1884_s9 = smov 125  }
 0x13d   : > { %v2806_v8 = vmul.f32 %v3613_v11, %v2471_v42  ;;  %v1240_v3 = vadd.f32 %v1238_v30, %v1196_v49  ;;  %v3616_v7 = vstv %s3546_s7  ;;  %v1120_v36 = vadd.f32 %v1118_v58, %v1076_v2  ;;  %s3624_s7 = sld [smem:[#allocation26_spill]] }
 0x13e   : > { %v1047_v52 = vadd.f32 %v1045_v62, %v1003_v63  ;;  %v1089_v31 = vmul.f32 %v3616_v7, %v2797_v29  ;;  %v3617_v38 = vstv %s3610_s10  ;;  %v3618_v40 = vstv %s3612_s1  ;;  %v2824_v63 = vld [vmem:[#allocation3 + $0x25] sm:$0xff] }
 0x13f   : > { %v1162_v18 = vmul.f32 %v3617_v38, %v2670_v1  ;;  %v1206_v22 = vmul.f32 %v3618_v40, %v2703_v53  ;;  %v965_v54 = vadd.f32 %v2590_v0, %v921_v60  ;;  %v1202_v26 = vadd.f32 %v1200_v51, %v1158_v17 }
 0x140   : > { %v1091_v35 = vadd.f32 %v1089_v31, %v1047_v52  ;;  %v3619_v49 = vstv %s3553_s11  ;;  %v3620_v58 = vstv %s3531_s3  ;;  %v3621_v2 = vstv %s3614_s29  ;;  %1320 = vrot.lane.b32.xlu0 %v1278_v47, %s1884_s9  ;;  %s3625_s11 = sld [smem:[#allocation27_spill]]  ;;  %v2839_v52 = vld [vmem:[#allocation3 + $0x26] sm:$0xff]  ;;  %s2847_s3 = sld [smem:[#allocation9 + $0x23]] }
 0x141   : > { %v1133_v30 = vmul.f32 %v3619_v49, %v2799_v56  ;;  %v1007_v62 = vmul.f32 %v3620_v58, %v2765_v59  ;;  %v1244_v11 = vmul.f32 %v3621_v2, %v2705_v48  ;;  %v3622_v7 = vstv %s3615_s26 }
 0x142   : > { %v1288_v38 = vmul.f32 %v3622_v7, %v2732_v28  ;;  %v3623_v0 = vstv %s3564_s23  ;;  %v1164_v51 = vadd.f32 %v1162_v18, %v1120_v36  ;;  %v3626_v40 = vstv %s3536_s30  ;;  %s1885_s30 = smov 124   ;;  %s2910_s23 = sld [smem:[#allocation9 + $0x31]] }
 0x143   : > { %v1177_v60 = vmul.f32 %v3623_v0, %v2812_v15  ;;  %v1135_v17 = vadd.f32 %v1133_v30, %v1091_v35  ;;  %v1009_v31 = vadd.f32 %v1007_v62, %v965_v54  ;;  %v1051_v49 = vmul.f32 %v3626_v40, %v2767_v13 }
 0x144   : > { %v3627_v58 = vstv %s3550_s12  ;;  %v1284_v7 = vadd.f32 %v1282_v41, %v1240_v3  ;;  %v3628_v36 = vstv %s3569_s22  ;;  %v927_v47 = vadd.f32 %v2611_v10, %v883_v57  ;;  %s3640_s12 = smov 127   ;;  %s3652_s22 = sld [smem:[#allocation62_spill]] }
 0x145   : > { %v1095_v2 = vmul.f32 %v3627_v58, %v2797_v29  ;;  %v1221_v18 = vmul.f32 %v3628_v36, %v2824_v63  ;;  %v3629_v35 = vstv %s3532_s16  ;;  %v1246_v54 = vadd.f32 %v1244_v11, %v1202_v26  ;;  %s3633_s16 = sld [smem:[#allocation55_spill]] }
 0x146   : > { %v1013_v30 = vmul.f32 %v3629_v35, %v2765_v59  ;;  %v1179_v62 = vadd.f32 %v1177_v60, %v1135_v17  ;;  %v1208_v0 = vadd.f32 %v1206_v22, %v1164_v51  ;;  %v1053_v40 = vadd.f32 %v1051_v49, %v1009_v31  ;;  %1330 = vrot.lane.b32.xlu0 %v1284_v7, %s1885_s30 }
 0x147   : > { %v3630_v58 = vstv %s3578_s14  ;;  %v3631_v41 = vstv %s3624_s7  ;;  %v3632_v36 = vstv %s3625_s11  ;;  %v971_v10 = vadd.f32 %v2616_v61, %v927_v47  ;;  %s3639_s14 = sld [smem:[#allocation56_spill]] }
 0x148   : > { %v1265_v25 = vmul.f32 %v3630_v58, %v2839_v52  ;;  %v1250_v3 = vmul.f32 %v3631_v41, %v2705_v48  ;;  %v1294_v21 = vmul.f32 %v3632_v36, %v2732_v28  ;;  %v1223_v57 = vadd.f32 %v1221_v18, %v1179_v62 }
 0x149   : > { %v1097_v26 = vadd.f32 %v1095_v2, %v1053_v40  ;;  %v3634_v22 = vstv %s3558_s4  ;;  %v3635_v60 = vstv %s3566_s28  ;;  %v1015_v17 = vadd.f32 %v1013_v30, %v971_v10  ;;  %s3645_s4 = sld [smem:[#allocation57_spill]]  ;;  %s3651_s28 = sld [smem:[#allocation61_spill]] }
 0x14a   : > { %v1139_v11 = vmul.f32 %v3634_v22, %v2799_v56  ;;  %v1183_v51 = vmul.f32 %v3635_v60, %v2812_v15  ;;  %v3636_v31 = vstv %s3540_s18  ;;  %v3637_v61 = vstv %s3551_s13  ;;  %s1886_s18 = smov 123   ;;  %s3644_s13 = sld [smem:[#allocation75_spill]] }
 0x14b   : > { %v1057_v49 = vmul.f32 %v3636_v31, %v2767_v13  ;;  %v1101_v47 = vmul.f32 %v3637_v61, %v2797_v29  ;;  %v845_v7 = vadd.f32 %v2632_v9, %v801_v34  ;;  %v1290_v18 = vadd.f32 %v1288_v38, %v1246_v54 }
 0x14c   : > { %v1267_v2 = vadd.f32 %v1265_v25, %v1223_v57  ;;  %v1252_v35 = vadd.f32 %v1250_v3, %v1208_v0  ;;  %v1141_v62 = vadd.f32 %v1139_v11, %v1097_v26  ;;  %v975_v30 = vmul.f32 %v973_v14, %v2559_v19 }
 0x14d   : > { %v1059_v40 = vadd.f32 %v1057_v49, %v1015_v17  ;;  %v889_v58 = vadd.f32 %v2647_v23, %v845_v7  ;;  %v3638_v41 = vstv %s3633_s16  ;;  %1340 = vrot.lane.b32.xlu0 %v1290_v18, %s1886_s18  ;;  %v3641_v9 = vstv %s3574_s27  ;;  %s1887_s27 = smov 122   ;;  %s3656_s16 = sld [smem:[#allocation83_spill]] }
 0x14e   : > { %v805_v36 = vmul.f32 %v3638_v41, %v2502_v55  ;;  %1302 = vrot.lane.b32.xlu1 %v1267_v2, %s3640_s12  ;;  %v1185_v25 = vadd.f32 %v1183_v51, %v1141_v62  ;;  %v1227_v34 = vmul.f32 %v3641_v9, %v2824_v63  ;;  %v3642_v23 = vstv %s3561_s21  ;;  %s3647_s21 = sld [smem:[#allocation81_spill]]  ;;  %s3666_s12 = sld [smem:[#allocation63_spill]] }
 0x14f   : > { %v1145_v38 = vmul.f32 %v3642_v23, %v2799_v56  ;;  %v905_v54 = vstv %s2847_s3  ;;  %v1103_v14 = vadd.f32 %v1101_v47, %v1059_v40  ;;  %v933_v0 = vadd.f32 %v2660_v6, %v889_v58 }
 0x150   : > { %v3643_v3 = vstv %s3533_s19  ;;  %v763_v57 = vadd.f32 %v2806_v8, %v2695_v5  ;;  %v1296_v26 = vadd.f32 %v1294_v21, %v1252_v35  ;;  %v1229_v22 = vadd.f32 %v1227_v34, %v1185_v25  ;;  %s3650_s19 = sld [smem:[#allocation60_spill]] }
 0x151   : > { %v1019_v10 = vmul.f32 %v3643_v3, %v2765_v59  ;;  %v3646_v11 = vstv %s3585_s17  ;;  %v3648_v51 = vstv %s3639_s14  ;;  %v1147_v6 = vadd.f32 %v1145_v38, %v1103_v14  ;;  %s3663_s14 = sld [smem:[#allocation94_spill]]  ;;  %s3684_s17 = sld [smem:[#allocation99_spill]] }
 0x152   : > { %v1271_v60 = vmul.f32 %v3646_v11, %v2839_v52  ;;  %v849_v17 = vmul.f32 %v3648_v51, %v2504_v24  ;;  %v3649_v31 = vstv %s3568_s20  ;;  %v977_v61 = vadd.f32 %v975_v30, %v933_v0  ;;  %1350 = vrot.lane.b32.xlu0 %v1296_v26, %s1887_s27  ;;  %s3658_s20 = sld [smem:[#allocation59_spill]] }
 0x153   : > { %v1189_v49 = vmul.f32 %v3649_v31, %v2812_v15  ;;  %v807_v21 = vadd.f32 %v805_v36, %v763_v57  ;;  %v3653_v8 = vstv %s3581_s6  ;;  %v3655_v7 = vstv %s3644_s13  ;;  %s3661_s6 = sld [smem:[#allocation89_spill]]  ;;  %s3671_s13 = sld [smem:[#allocation28_spill]] }
 0x154   : > { %v1273_v5 = vadd.f32 %v1271_v60, %v1229_v22  ;;  %v1233_v47 = vmul.f32 %v3653_v8, %v2824_v63  ;;  %v1063_v18 = vmul.f32 %v3655_v7, %v2767_v13  ;;  %v3657_v2 = vstv %s3645_s4  ;;  %s3672_s4 = sld [smem:[#allocation29_spill]] }
 0x155   : > { %v893_v35 = vmul.f32 %v3657_v2, %v2535_v12  ;;  %v1191_v62 = vadd.f32 %v1189_v49, %v1147_v6  ;;  %v1021_v40 = vadd.f32 %v1019_v10, %v977_v61  ;;  %v3659_v58 = vstv %s3647_s21  ;;  %s3675_s21 = sld [smem:[#allocation91_spill]] }
 0x156   : > { %v1107_v30 = vmul.f32 %v3659_v58, %v2797_v29  ;;  %v851_v41 = vadd.f32 %v849_v17, %v807_v21  ;;  %1312 = vrot.lane.b32.xlu1 %v1273_v5, %s1883_s24  ;;  %v3660_v36 = vstv %s3588_s25  ;;  %v3662_v9 = vstv %s3650_s19  ;;  %s3669_s25 = sld [smem:[#allocation64_spill]]  ;;  %s3670_s24 = sld [smem:[#allocation106_spill]] }
 0x157   : > { %v1277_v25 = vmul.f32 %v3660_v36, %v2839_v52  ;;  %v723_v34 = vmul.f32 %v3662_v9, %v2469_v32  ;;  %v3664_v23 = vstv %s3651_s28  ;;  %v3665_v14 = vstv %s3652_s22  ;;  %s3676_s19 = sld [smem:[#allocation96_spill]]  ;;  %s3678_s28 = sld [smem:[#allocation65_spill]] }
 0x158   : > { %v767_v38 = vmul.f32 %v3664_v23, %v2471_v42  ;;  %v811_v0 = vmul.f32 %v3665_v14, %v2502_v55  ;;  %v1235_v3 = vadd.f32 %v1233_v47, %v1191_v62  ;;  %v1065_v10 = vadd.f32 %v1063_v18, %v1021_v40  ;;  %s3682_s22 = sld [smem:[#allocation67_spill]] }
 0x159   : > { %v895_v57 = vadd.f32 %v893_v35, %v851_v41  ;;  %v937_v26 = vmul.f32 %v935_v20, %v2546_v44  ;;  %v3667_v22 = vstv %s3656_s16  ;;  %v3668_v60 = vstv %s3658_s20  ;;  %s2983_s16 = sld [smem:[#allocation9 + $0x38]]  ;;  %s3692_s20 = sld [smem:[#allocation101_spill]] }
 0x15a   : > { %v1151_v11 = vmul.f32 %v3667_v22, %v2799_v56  ;;  %v981_v51 = vmul.f32 %v3668_v60, %v2559_v19  ;;  %v769_v17 = vadd.f32 %v767_v38, %v723_v34  ;;  %v949_v6 = vstv %s2896_s0 }
 0x15b   : > { %v1279_v31 = vadd.f32 %v1277_v25, %v1235_v3  ;;  %v1109_v49 = vadd.f32 %v1107_v30, %v1065_v10  ;;  %v939_v61 = vadd.f32 %v937_v26, %v895_v57  ;;  %v3673_v21 = vstv %s3661_s6  ;;  %s2991_s6 = sld [smem:[#allocation9 + $0x3f]] }
 0x15c   : > { %v1025_v5 = vmul.f32 %v3673_v21, %v2765_v59  ;;  %v3674_v20 = vstv %s3663_s14  ;;  %v813_v47 = vadd.f32 %v811_v0, %v769_v17  ;;  %v3677_v7 = vstv %s3666_s12  ;;  %s3050_s14 = sld [smem:[#allocation9 + $0x5b]] }
 0x15d   : > { %v1195_v8 = vmul.f32 %v3674_v20, %v2812_v15  ;;  %v855_v18 = vmul.f32 %v3677_v7, %v2504_v24  ;;  %v993_v2 = vstv %s2910_s23  ;;  %1322 = vrot.lane.b32.xlu1 %v1279_v31, %s1884_s9  ;;  %v1153_v35 = vadd.f32 %v1151_v11, %v1109_v49  ;;  %s3686_s9 = sld [smem:[#allocation31_spill]] }
 0x15e   : > { %v3679_v62 = vstv %s3595_s8  ;;  %v983_v58 = vadd.f32 %v981_v51, %v939_v61  ;;  %v3680_v30 = vstv %s3669_s25  ;;  %v3681_v25 = vstv %s3670_s24  ;;  %s3688_s8 = sld [smem:[#allocation37_spill]] }
 0x15f   : > { %v1239_v40 = vmul.f32 %v3679_v62, %v2824_v63  ;;  %v899_v41 = vmul.f32 %v3680_v30, %v2535_v12  ;;  %v857_v36 = vadd.f32 %v855_v18, %v813_v47  ;;  %v686_v9 = vmul.f32 %v3681_v25, %v2333_v45 }
 0x160   : > { %v3683_v34 = vstv %s3671_s13  ;;  %v3685_v38 = vstv %s3672_s4  ;;  %v1197_v0 = vadd.f32 %v1195_v8, %v1153_v35  ;;  %v1027_v3 = vadd.f32 %v1025_v5, %v983_v58 }
 0x161   : > { %v730_v23 = vmul.f32 %v3683_v34, %v2335_v27  ;;  %v774_v14 = vmul.f32 %v3685_v38, %v2373_v39  ;;  %v3687_v10 = vstv %s3675_s21  ;;  %v3689_v26 = vstv %s3676_s19 }
 0x162   : > { %v1069_v57 = vmul.f32 %v3687_v10, %v2767_v13  ;;  %v1113_v22 = vmul.f32 %v3689_v26, %v2797_v29  ;;  %v3690_v45 = vstv %s3602_s5  ;;  %v901_v27 = vadd.f32 %v899_v41, %v857_v36  ;;  %s3695_s5 = sld [smem:[#allocation103_spill]] }
 0x163   : > { %v1283_v11 = vmul.f32 %v3690_v45, %v2839_v52  ;;  %v3691_v39 = vstv %s3678_s28  ;;  %v732_v51 = vadd.f32 %v730_v23, %v686_v9  ;;  %v1241_v17 = vadd.f32 %v1239_v40, %v1197_v0 }
 0x164   : > { %v943_v60 = vmul.f32 %v3691_v39, %v2546_v44  ;;  %v1071_v31 = vadd.f32 %v1069_v57, %v1027_v3  ;;  %v3693_v49 = vstv %s3682_s22  ;;  %v3694_v21 = vstv %s3684_s17 }
 0x165   : > { %v987_v61 = vmul.f32 %v3693_v49, %v2559_v19  ;;  %v1031_v5 = vmul.f32 %v3694_v21, %v2765_v59  ;;  %v776_v8 = vadd.f32 %v774_v14, %v732_v51  ;;  %v3696_v47 = vstv %s3686_s9 }
 0x166   : > { %v945_v20 = vadd.f32 %v943_v60, %v901_v27  ;;  %v818_v7 = vmul.f32 %v3696_v47, %v2375_v37  ;;  %v3697_v18 = vstv %s3688_s8  ;;  %v1285_v62 = vadd.f32 %v1283_v11, %v1241_v17 }
 0x167   : > { %v862_v35 = vmul.f32 %v3697_v18, %v2414_v46  ;;  %v1115_v40 = vadd.f32 %v1113_v22, %v1071_v31  ;;  %v3698_v58 = vstv %s3594_s2  ;;  %v3699_v41 = vstv %s3597_s15  ;;  %s3021_s15 = sld [smem:[#allocation9 + $0x46]]  ;;  %s3023_s2 = sld [smem:[#allocation9 + $0x4d]] }
 0x168   : > { %v1157_v30 = vmul.f32 %v3698_v58, %v2799_v56  ;;  %v1201_v36 = vmul.f32 %v3699_v41, %v2812_v15  ;;  %v989_v25 = vadd.f32 %v987_v61, %v945_v20  ;;  %v3700_v9 = vstv %s3692_s20  ;;  %1332 = vrot.lane.b32.xlu1 %v1285_v62, %s1885_s30  ;;  %s3048_s30 = sld [smem:[#allocation9 + $0x54]] }
 0x169   : > { %v1075_v34 = vmul.f32 %v3700_v9, %v2767_v13  ;;  %v820_v37 = vadd.f32 %v818_v7, %v776_v8  ;;  %v3701_v23 = vstv %s3670_s24  ;;  %v3702_v14 = vstv %s3695_s5 }
 0x16a   : > { %v687_v46 = vmul.f32 %v3701_v23, %v2469_v32  ;;  %v1159_v38 = vadd.f32 %v1157_v30, %v1115_v40  ;;  %v1119_v0 = vmul.f32 %v3702_v14, %v2797_v29  ;;  %v3703_v3 = vstv %s3671_s13  ;;  %s1888_s13 = smov [#allocation10]  }
 0x16b   : > { %v731_v10 = vmul.f32 %v3703_v3, %v2471_v42  ;;  %v3704_v57 = vstv %s3672_s4  ;;  %v1033_v32 = vadd.f32 %v1031_v5, %v989_v25  ;;  %v864_v22 = vadd.f32 %v862_v35, %v820_v37  ;;  %s1786_s4 = sshll.u32 %s1888_s13, 4  ;;  %s1787_s4 = int_to_ptr.vmem [resolvable:$false] %s1786_s4 }
 0x16c   : > { %v775_v26 = vmul.f32 %v3704_v57, %v2502_v55  ;;  %v906_v45 = vmul.f32 %v905_v54, %v2433_v33  ;;  %v950_v11 = vmul.f32 %v949_v6, %v2464_v16  ;;  %v1203_v27 = vadd.f32 %v1201_v36, %v1159_v38  ;;  %s1788_s21 = scalar_lea.vmem %s1787_s4, 512 }
 0x16d   : > { %v3705_v39 = vstv %s3614_s29  ;;  %v1037_v51 = vstv %s2983_s16  ;;  %v733_v42 = vadd.f32 %v731_v10, %v687_v46  ;;  %v1077_v17 = vadd.f32 %v1075_v34, %v1033_v32  ;;  %s3713_s29 = sld [smem:[#allocation24_spill]] }
 0x16e   : > { %v1245_v60 = vmul.f32 %v3705_v39, %v2824_v63  ;;  %v908_v55 = vadd.f32 %v906_v45, %v864_v22  ;;  %v994_v31 = vmul.f32 %v993_v2, %v2618_v43  ;;  %v1081_v49 = vstv %s2991_s6 }
 0x16f   : > { %v3706_v33 = vstv %s3615_s26  ;;  %v777_v16 = vadd.f32 %v775_v26, %v733_v42  ;;  %v3707_v5 = vmov %v3696_v47  ;;  %v1121_v8 = vadd.f32 %v1119_v0, %v1077_v17  ;;  %s3714_s26 = sld [smem:[#allocation17_spill]] }
 0x170   : > { %v1247_v61 = vadd.f32 %v1245_v60, %v1203_v27  ;;  %v1289_v21 = vmul.f32 %v3706_v33, %v2839_v52  ;;  %v819_v20 = vmul.f32 %v3707_v5, %v2504_v24  ;;  %v3708_v47 = vstv %s3610_s10  ;;  %s3097_s10 = sld [smem:[#allocation4]] }
 0x171   : > { %v1163_v43 = vmul.f32 %v3708_v47, %v2799_v56  ;;  %v952_v7 = vadd.f32 %v950_v11, %v908_v55  ;;  %v3709_v35 = vstv %s3612_s1  ;;  %v3710_v58 = vstv %s3688_s8 }
 0x172   : > { %v1291_v18 = vadd.f32 %v1289_v21, %v1247_v61  ;;  %v1207_v62 = vmul.f32 %v3709_v35, %v2812_v15  ;;  %v821_v40 = vadd.f32 %v819_v20, %v777_v16  ;;  %v863_v30 = vmul.f32 %v3710_v58, %v2535_v12 }
 0x173   : > { %v1165_v41 = vadd.f32 %v1163_v43, %v1121_v8  ;;  %v996_v24 = vadd.f32 %v994_v31, %v952_v7  ;;  %v1038_v36 = vmul.f32 %v1037_v51, %v2620_v50  ;;  %v1082_v25 = vmul.f32 %v1081_v49, %v2668_v4  ;;  %s1498_s1 = sshll.u32 %s3713_s29, 4  ;;  %s1378_s25 = scalar_lea.sflag [#allocation7], %s3713_s29 }
 0x174   : > { %1342 = vrot.lane.b32.xlu1 %v1291_v18, %s1886_s18  ;;  %v1125_v9 = vstv %s3021_s15  ;;  %v1169_v34 = vstv %s3023_s2  ;;  %v865_v37 = vadd.f32 %v863_v30, %v821_v40  ;;  %v907_v23 = vmul.f32 %v905_v54, %v2546_v44 }
 0x175   : > { %v1209_v46 = vadd.f32 %v1207_v62, %v1165_v41  ;;  %v3711_v12 = vstv %s3624_s7  ;;  %v1040_v14 = vadd.f32 %v1038_v36, %v996_v24  ;;  %v3712_v0 = vstv %s3625_s11  ;;  %s217_s7 = scalar_lea.vmem [#allocation10], %s1498_s1  ;;  %s3715_s11 = sld [smem:[#allocation22_spill]] }
 0x176   : > { %v1251_v38 = vmul.f32 %v3711_v12, %v2824_v63  ;;  %v1295_v50 = vmul.f32 %v3712_v0, %v2839_v52  ;;  %v909_v3 = vadd.f32 %v907_v23, %v865_v37  ;;  %v951_v4 = vmul.f32 %v949_v6, %v2559_v19  ;;  %s1636_s3 = sshll.u32 %s3714_s26, 8  ;;  %s1391_s18 = sshll.u32 %s217_s7, 4  ;;  %s3108_s18 = int_to_ptr.vmem [resolvable:$true] %s1391_s18 }
 0x177   : > { %v995_v10 = vmul.f32 %v993_v2, %v2765_v59  ;;  %v1084_v26 = vadd.f32 %v1082_v25, %v1040_v14  ;;  %v1126_v32 = vmul.f32 %v1125_v9, %v2670_v1  ;;  %v1170_v44 = vmul.f32 %v1169_v34, %v2703_v53  ;;  %s1782_s24 = scalar_lea.vmem %s3108_s18, 256  ;;  %p1789_p4 = scmp.lt.s32.totalorder %s3108_s18, %s1787_s4 }
 0x178   : > { %v1253_v57 = vadd.f32 %v1251_v38, %v1209_v46  ;;  %v1213_v54 = vstv %s3048_s30  ;;  %v1257_v22 = vstv %s3050_s14  ;;  %v953_v45 = vadd.f32 %v951_v4, %v909_v3  ;;  %p1783_p8 = scmp.ne.s32.totalorder %s3108_s18, %s1782_s24  ;;  %p1790_p9 = scmp.lt.s32.totalorder %s1788_s21, %s1782_s24 }
 0x179   : > { %v1128_v27 = vadd.f32 %v1126_v32, %v1084_v26  ;;  %v1039_v60 = vmul.f32 %v1037_v51, %v2767_v13  ;;  %v1083_v42 = vmul.f32 %v1081_v49, %v2797_v29  ;;  %v1214_v59 = vmul.f32 %v1213_v54, %v2705_v48 }
 0x17a   : > { %v1297_v11 = vadd.f32 %v1295_v50, %v1253_v57  ;;  %v997_v39 = vadd.f32 %v995_v10, %v953_v45  ;;  %v1258_v6 = vmul.f32 %v1257_v22, %v2732_v28  ;;  %v1127_v53 = vmul.f32 %v1125_v9, %v2799_v56  ;;  %p1791_p13 = por %p1790_p9, %p1789_p4 }
 0x17b   : > { %v1172_v19 = vadd.f32 %v1170_v44, %v1128_v27  ;;  %v1171_v31 = vmul.f32 %v1169_v34, %v2812_v15  ;;  %v1215_v13 = vmul.f32 %v1213_v54, %v2824_v63  ;;  %v1259_v29 = vmul.f32 %v1257_v22, %v2839_v52  ;;  %p3717_p2 = scmp.ne.s32.totalorder %s3715_s11, 0 }
 0x17c   : > { %1352 = vrot.lane.b32.xlu1 %v1297_v11, %s1887_s27  ;;  %v1041_v1 = vadd.f32 %v1039_v60, %v997_v39  ;;  %v1359_v63 = vstv %s3097_s10  ;;  %s3716_s27 = sld [smem:[#allocation109_spill]] }
 0x17d   : > { %v1216_v2 = vadd.f32 %v1214_v59, %v1172_v19  ;;  %p1784_p12 = pnand %p1783_p8, %p3717_p2 }
 0x17e   : > { %v1085_v17 = vadd.f32 %v1083_v42, %v1041_v1 }
 0x17f   : > { %v1260_v55 = vadd.f32 %v1258_v6, %v1216_v2  ;;  %p1785_p5 = pneg %p1784_p12 }
 0x180   : > { %v1129_v61 = vadd.f32 %v1127_v53, %v1085_v17 }
 0x181   : > { %p1792_p11 = pnand %p1791_p13, %p1785_p5 }
 0x182   : > { %v1173_v51 = vadd.f32 %v1171_v31, %v1129_v61  ;;  %s3106_s12 = scalar_lea.hbm %s3716_s27, %s1636_s3 }
 0x184   : > { %v1217_v49 = vadd.f32 %v1215_v13, %v1173_v51 }
 0x186   : > { %v1261_v33 = vadd.f32 %v1259_v29, %v1217_v49 }
 0x1a8   : > { %v1301_v21 = vpop.permute.xlu0 %1300 }
 0x1a9   : > { %v1306_v28 = vadd.f32 %v1301_v21, %v1260_v55 }
 0x1ae   : > { %v1311_v48 = vpop.permute.xlu0 %1310 }
 0x1af   : > { %v1316_v56 = vadd.f32 %v1311_v48, %v1306_v28 }
 0x1b2   : > { %v1321_v16 = vpop.permute.xlu0 %1320 }
 0x1b3   : > { %v1326_v20 = vadd.f32 %v1321_v16, %v1316_v56 }
 0x1b8   : > { %v1331_v5 = vpop.permute.xlu0 %1330 }
 0x1b9   : > { %v1336_v15 = vadd.f32 %v1331_v5, %v1326_v20 }
 0x1bf   : > { %v1341_v8 = vpop.permute.xlu0 %1340 }
 0x1c0   : > { %v1346_v47 = vadd.f32 %v1341_v8, %v1336_v15  ;;  %v1303_v43 = vpop.permute.xlu1 %1302 }
 0x1c1   : > { %v1307_v24 = vadd.f32 %v1303_v43, %v1261_v33 }
 0x1c4   : > { %v1351_v7 = vpop.permute.xlu0 %1350 }
 0x1c5   : > { %v1356_v52 = vadd.f32 %v1351_v7, %v1346_v47 }
 0x1c7   : > { %v1360_v18 = vadd.f32 %v1359_v63, %v1356_v52 }
 0x1c8   : > { %v1313_v62 = vpop.permute.xlu1 %1312 }
 0x1c9   : > { %v1628_v35 = vmul.f32 -1.442695, %v1360_v18  ;;  %v1317_v36 = vadd.f32 %v1313_v62, %v1307_v24 }
 0x1cb   : > { %1729 = vpow2.f32 %v1628_v35 }
 0x1cf   : > { %v1323_v40 = vpop.permute.xlu1 %1322 }
 0x1d0   : > { %v1327_v9 = vadd.f32 %v1323_v40, %v1317_v36 }
 0x1d5   : > { %v1730_v58 = vpop.eup %1729 }
 0x1d6   : > { %v1368_v30 = vadd.f32 1.0, %v1730_v58 }
 0x1d8   : > { %1731 = vrcp.f32 %v1368_v30 }
 0x1da   : > { %v1333_v41 = vpop.permute.xlu1 %1332 }
 0x1db   : > { %v1337_v34 = vadd.f32 %v1333_v41, %v1327_v9 }
 0x1e2   : > { %v1732_v23 = vpop.eup %1731 }
 0x1e3   : > { %1375 = vst.msk [vmem:[%s217_s7] sm:$0xff] %vm1374_vm5, %v1732_v23 }
 0x1e6   : > { %v1343_v25 = vpop.permute.xlu1 %1342 }
 0x1e7   : > { %v1347_v37 = vadd.f32 %v1343_v25, %v1337_v34 }
 0x1ee   : > { %v1353_v46 = vpop.permute.xlu1 %1352 }
 0x1ef   : > { %v1357_v12 = vadd.f32 %v1353_v46, %v1347_v37 }
 0x1f1   : > { %v1361_v38 = vadd.f32 %v1359_v63, %v1357_v12 }
 0x1f3   : > { %v1629_v14 = vmul.f32 -1.442695, %v1361_v38 }
 0x1f5   : > { %1733 = vpow2.f32 %v1629_v14 }
 0x1ff   : > { %v1734_v0 = vpop.eup %1733 }
 0x200   : > { %v1369_v50 = vadd.f32 1.0, %v1734_v0 }
 0x202   : > { %1735 = vrcp.f32 %v1369_v50 }
 0x20c   : > { %v1736_v3 = vpop.eup %1735 }
 0x20d   : > { %1376 = vst.msk [vmem:[%s217_s7 + $0x8] sm:$0xff] %vm1374_vm5, %v1736_v3 }
 0x20e   : > { %1795 = shalt.err (!%p1792_p11)
}
 0x20f   : > { %s1796_s19 = scalar_lea.hbm %s3106_s12, 256  ;;  %s1800_s17 = scalar_lea.hbm %s3716_s27, 512 }
 0x210   : > { %p1797_p3 = scmp.ne.s32.totalorder %s3106_s12, %s1796_s19  ;;  %p1801_p6 = scmp.lt.u32.totalorder %s3106_s12, %s3716_s27 }
 0x211   : > { %p1802_p1 = scmp.lt.u32.totalorder %s1800_s17, %s1796_s19  ;;  %p1804_p8 = scmp.lt.u32.totalorder %s1796_s19, %s3106_s12 }
 0x212   : > { %p1798_p7 = pnand %p1797_p3, %p3717_p2 }
 0x213   : > { %p1803_p0 = por %p1802_p1, %p1801_p6 }
 0x214   : > { %p1799_p10 = pneg %p1798_p7 }
 0x215   : > { %p1805_p12 = por %p1804_p8, %p1803_p0 }
 0x217   : > { %p1806_p5 = pnand %p1805_p12, %p1799_p10 }
 0x219   : > { %1809 = shalt.err (!%p1806_p5)
}
 0x21a   : > { %s1889_s16 = smov 128   ;;  %s1890_s20 = smov 8  }
 0x21b   : > { %1643 = dma.vmem_to_hbm [thread:$0]  (%p3717_p2), %s3108_s18, 256, %s3106_s12, %s1378_s25, %s1889_s16, %s1889_s16, %s1890_s20  }
 0x21c PF: > { %s3718_s6 = sld [smem:[#allocation14_spill]]  ;;  %s3719_s5 = sld [smem:[#allocation20_spill]] }
 0x21d   : > { %s3720_s15 = sld [smem:[#allocation19_spill]] }
 0x222   : > { %s1406_s2 = sand.u32 1, %s3718_s6   ;;  %p3721_p4 = scmp.ne.s32.totalorder %s3719_s5, 0 }
 0x223   : > { %p3722_p9 = scmp.ge.s32.totalorder %s3720_s15, 2  ;;  %s1407_s30 = scalar_lea.sflag [#allocation7], %s1406_s2 }
 0x225   : > { %p1654_p13 = pnand %p3722_p9, %p3721_p4 }
 0x227   : > { %1843 = dma.done.wait (!%p1654_p13), %s1407_s30, 256  }
 0x228   : > { %1845 = vsyncadd (!%p1654_p13), %s1407_s30, 4294967040  ;;  %s21_s19 = sadd.s32 1, %s3720_s15   ;;  %s3723_s14 = sld [smem:[#allocation15_spill]] }
 0x229   : > { %p18_p11 = scmp.ge.s32.totalorder %s21_s19, 4   ;;  %s3724_s15 = sld [smem:[#allocation16_spill]] }
 0x22a   : > { %s3725_s16 = sld [smem:[#allocation23_spill]]  ;;  %s3726_s17 = sld [smem:[#allocation18_spill]] }
 0x22b   : > { %s3727_s18 = sld [smem:[#allocation21_spill]]  ;;  %20 = sbr.rel (!%p18_p11) target bundleno = 12 (0xc), region = 97 }
 0x232   :  { %1412 = vsyncpa [#allocation6], 1 }
 0x233   :  { %1414 = vsyncpa [#allocation6 + $0x1], 1 }
 0x234   :  { %1415 = vsyncpa [#allocation7], 1 }
 0x235   :  { %1417 = vsyncpa [#allocation7 + $0x1], 1 }
 0x236   :  { %1418 = vsyncpa [#allocation8], 1 }
 0x237   :  { %1420 = vsyncpa [#allocation8 + $0x1], 1 }

</bundles_post_ra>
